<compile_context>
chip_gen: v7x
topology: tpu7x:2x2x1
jax: 0.10.0
libtpu: 0.0.40
codegen_flags: <defaults>
</compile_context>

<pallas_src>
import functools
import math

import jax
import jax.numpy as jnp
import numpy as np
from jax import lax
from jax.experimental import pallas as pl
from jax.experimental.pallas import tpu as pltpu

NUM_HEADS = 4
LN_EPS = 1e-5
NUM_PARAM_ROWS = 10  # ln1_g, ln1_b, bq, bk, bv, bo, ln2_g, ln2_b, b1, b2


def _layernorm(v, g, b):
    mu = jnp.mean(v, axis=-1, keepdims=True)
    var = jnp.mean((v - mu) ** 2, axis=-1, keepdims=True)
    return (v - mu) * lax.rsqrt(var + LN_EPS) * g + b


def self_attention_kernel(x_ref, rows_ref, wqkv_ref, wo_ref, w1_ref, w2_ref,
                          o_ref, *, seq_len, approx_recip):
    N, C = x_ref.shape                       # N = batch_block * L
    L = seq_len
    B = N // L
    H = NUM_HEADS
    Dh = C // H
    scale = 1.0 / math.sqrt(Dh)
    mm_dtype = wqkv_ref.dtype                # bf16 or f32 matmul operands

    x = x_ref[...]                           # (N, C) f32
    P = rows_ref[...]                        # (10, C) f32
    ln1_g, ln1_b = P[0:1], P[1:2]
    bq, bk, bv = P[2:3], P[3:4], P[4:5]
    bo = P[5:6]
    ln2_g, ln2_b = P[6:7], P[7:8]
    b1, b2 = P[8:9], P[9:10]

    # --- LayerNorm before attention (self.ln), f32 ---
    x_ln = _layernorm(x, ln1_g, ln1_b)

    # --- fused QKV projection: one (N,C)x(C,3C) MXU launch ---
    qkv = jnp.dot(x_ln.astype(mm_dtype), wqkv_ref[...],
                  preferred_element_type=jnp.float32)            # (N, 3C) f32
    q = (qkv[:, 0:C] + bq).reshape(B, L, C)
    k = (qkv[:, C:2 * C] + bk).reshape(B, L, C)
    v = (qkv[:, 2 * C:3 * C] + bv).reshape(B, L, C)

    # --- per-head attention, batched over B (rank-3 einsums) ---
    head_outs = []
    for h in range(H):
        sl = slice(h * Dh, (h + 1) * Dh)
        qh = q[..., sl].astype(mm_dtype)
        kh = k[..., sl].astype(mm_dtype)
        vh = v[..., sl].astype(mm_dtype)
        s = jnp.einsum('bqd,bkd->bqk', qh, kh,
                       preferred_element_type=jnp.float32) * scale   # (B, L, L)
        s = s - jnp.max(s, axis=-1, keepdims=True)
        p = jnp.exp(s)
        denom = jnp.sum(p, axis=-1, keepdims=True)
        p = p * pl.reciprocal(denom, approx=approx_recip)
        head_outs.append(
            jnp.einsum('bqk,bkd->bqd', p.astype(mm_dtype), vh,
                       preferred_element_type=jnp.float32))           # (B, L, Dh)
    attn = jnp.concatenate(head_outs, axis=-1).reshape(N, C)          # (N, C)

    # --- output projection + residual 1 ---
    attn = jnp.dot(attn.astype(mm_dtype), wo_ref[...],
                   preferred_element_type=jnp.float32) + bo
    av = attn + x

    # --- ff_self: LayerNorm -> Linear -> GELU(exact erf) -> Linear, + residual ---
    h_ln = _layernorm(av, ln2_g, ln2_b)
    f = jnp.dot(h_ln.astype(mm_dtype), w1_ref[...],
                preferred_element_type=jnp.float32) + b1
    f = 0.5 * f * (1.0 + lax.erf(f * (1.0 / math.sqrt(2.0))))
    f = jnp.dot(f.astype(mm_dtype), w2_ref[...],
                preferred_element_type=jnp.float32) + b2

    # TODO(synk): output last dim is C=32 (<128 lanes) -> masked stores; a
    # lane-dense (batch_block, L*C) repack is a possible further win (measure).
    o_ref[...] = (f + av).astype(o_ref.dtype)


def make_params(channels, key):
    C = channels
    ks = jax.random.split(key, 12)
    s = 1.0 / math.sqrt(C)
    in_proj_w = jax.random.uniform(ks[0], (3 * C, C), jnp.float32, -s, s)
    in_proj_b = jax.random.uniform(ks[1], (3 * C,), jnp.float32, -s, s)
    out_proj_w = jax.random.uniform(ks[2], (C, C), jnp.float32, -s, s)
    out_proj_b = jax.random.uniform(ks[3], (C,), jnp.float32, -s, s)
    ln1_g = 1.0 + 0.1 * jax.random.normal(ks[4], (C,), jnp.float32)
    ln1_b = 0.1 * jax.random.normal(ks[5], (C,), jnp.float32)
    ln2_g = 1.0 + 0.1 * jax.random.normal(ks[6], (C,), jnp.float32)
    ln2_b = 0.1 * jax.random.normal(ks[7], (C,), jnp.float32)
    w1 = jax.random.uniform(ks[8], (C, C), jnp.float32, -s, s)
    b1 = jax.random.uniform(ks[9], (C,), jnp.float32, -s, s)
    w2 = jax.random.uniform(ks[10], (C, C), jnp.float32, -s, s)
    b2 = jax.random.uniform(ks[11], (C,), jnp.float32, -s, s)
    return dict(in_proj_w=in_proj_w, in_proj_b=in_proj_b,
                out_proj_w=out_proj_w, out_proj_b=out_proj_b,
                ln1_g=ln1_g, ln1_b=ln1_b, ln2_g=ln2_g, ln2_b=ln2_b,
                w1=w1, b1=b1, w2=w2, b2=b2)


def self_attention_pallas(x_ncl, params, *, matmul_dtype=jnp.float32,
                          approx_recip=True, batch_block=None):
    """x_ncl: (B, channels, length) float32, like the PyTorch module input.

    matmul_dtype=jnp.bfloat16 casts MXU operands (recommended on v6e/v7x);
    elementwise math (LN / softmax / GELU / residuals) stays float32.
    batch_block controls grid splitting (default: whole batch in one step;
    use B//2 on v7x to give each TensorCore a block).
    """
    B, C, L = x_ncl.shape
    assert C % NUM_HEADS == 0
    if batch_block is None:
        batch_block = B
    assert B % batch_block == 0
    n_blocks = B // batch_block

    # torch .view(-1, length, channels) is a row-major reinterpretation; flatten
    # tokens into one (B*L, C) slab so every projection matmul sees M = B*L.
    x = jnp.reshape(x_ncl, (B * L, C)).astype(jnp.float32)

    p = params
    # Fused QKV weight (C, 3C) = [Wq^T | Wk^T | Wv^T]; all Linear weights are
    # pre-transposed so the kernel computes x @ W.
    wqkv = p["in_proj_w"].T.astype(matmul_dtype)          # (C, 3C)
    wo = p["out_proj_w"].T.astype(matmul_dtype)           # (C, C)
    w1 = p["w1"].T.astype(matmul_dtype)                   # (C, C)
    w2 = p["w2"].T.astype(matmul_dtype)                   # (C, C)

    # All 1-row parameters packed into a single (10, C) array -> one DMA.
    rows = jnp.stack([
        p["ln1_g"], p["ln1_b"],
        p["in_proj_b"][0:C], p["in_proj_b"][C:2 * C], p["in_proj_b"][2 * C:3 * C],
        p["out_proj_b"],
        p["ln2_g"], p["ln2_b"],
        p["b1"], p["b2"],
    ], axis=0).astype(jnp.float32)                        # (10, C)

    kernel = functools.partial(self_attention_kernel, seq_len=L,
                               approx_recip=approx_recip)

    out = pl.pallas_call(
        kernel,
        out_shape=jax.ShapeDtypeStruct((B * L, C), jnp.float32),
        grid=(n_blocks,),
        in_specs=[
            pl.BlockSpec((batch_block * L, C), lambda i: (i, 0)),   # activations
            pl.BlockSpec((NUM_PARAM_ROWS, C), lambda i: (0, 0)),    # packed rows
            pl.BlockSpec((C, 3 * C), lambda i: (0, 0)),             # fused QKV W
            pl.BlockSpec((C, C), lambda i: (0, 0)),                 # out_proj W
            pl.BlockSpec((C, C), lambda i: (0, 0)),                 # ffn W1
            pl.BlockSpec((C, C), lambda i: (0, 0)),                 # ffn W2
        ],
        out_specs=pl.BlockSpec((batch_block * L, C), lambda i: (i, 0)),
        compiler_params=pltpu.CompilerParams(
            dimension_semantics=("parallel",),
            vmem_limit_bytes=32 * 1024 * 1024,
        ),
    )(x, rows, wqkv, wo, w1, w2)

    # torch .view(-1, channels, length) (row-major reinterpretation).
    return jnp.reshape(out, (B, C, L))


def self_attention_reference(x_ncl, params):
    """Pure-JAX reference mirroring the PyTorch forward (f32 throughout)."""
    B, C, L = x_ncl.shape
    H, Dh = NUM_HEADS, C // NUM_HEADS
    p = params
    x = jnp.reshape(x_ncl, (B, L, C))

    def ln(v, g, b):
        mu = jnp.mean(v, axis=-1, keepdims=True)
        var = jnp.mean((v - mu) ** 2, axis=-1, keepdims=True)
        return (v - mu) / jnp.sqrt(var + LN_EPS) * g + b

    x_ln = ln(x, p["ln1_g"], p["ln1_b"])
    qkv_w, qkv_b = p["in_proj_w"], p["in_proj_b"]
    q = x_ln @ qkv_w[:C].T + qkv_b[:C]
    k = x_ln @ qkv_w[C:2 * C].T + qkv_b[C:2 * C]
    v = x_ln @ qkv_w[2 * C:].T + qkv_b[2 * C:]
    q = q.reshape(B, L, H, Dh)
    k = k.reshape(B, L, H, Dh)
    v = v.reshape(B, L, H, Dh)
    s = jnp.einsum("blhd,bmhd->bhlm", q, k) / math.sqrt(Dh)
    a = jax.nn.softmax(s, axis=-1)
    o = jnp.einsum("bhlm,bmhd->blhd", a, v).reshape(B, L, C)
    o = o @ p["out_proj_w"].T + p["out_proj_b"]
    av = o + x
    h = ln(av, p["ln2_g"], p["ln2_b"])
    f = h @ p["w1"].T + p["b1"]
    f = 0.5 * f * (1.0 + lax.erf(f / math.sqrt(2.0)))
    f = f @ p["w2"].T + p["b2"]
    out = f + av
    return jnp.reshape(out, (B, C, L))


if __name__ == "__main__":
    B, C, L = 2, 32, 16                      # batch, channels, length (C % 4 == 0)
    key = jax.random.PRNGKey(0)
    kx, kp = jax.random.split(key)
    x = jax.random.normal(kx, (B, C, L), jnp.float32)
    params = make_params(C, kp)

    ref = jax.block_until_ready(self_attention_reference(x, params))

    # Strict-correctness config: f32 matmuls, exact softmax reciprocal.
    out_f32 = jax.block_until_ready(
        self_attention_pallas(x, params, matmul_dtype=jnp.float32,
                              approx_recip=False))
    np.testing.assert_allclose(np.asarray(out_f32), np.asarray(ref),
                               rtol=2e-5, atol=2e-5)

    # Perf config (per review, for v6e/v7x): bf16 MXU operands + f32 accum,
    # EUP approximate reciprocal for the softmax denominator.
    out_bf16 = jax.block_until_ready(
        self_attention_pallas(x, params, matmul_dtype=jnp.bfloat16,
                              approx_recip=True))
    np.testing.assert_allclose(np.asarray(out_bf16), np.asarray(ref),
                               rtol=3e-2, atol=3e-2)

    print("KERNEL_OK")
</pallas_src>

<mosaic_0001>
module attributes {stable_mosaic.version = 11 : i64} {
  func.func @self_attention_kernel(%arg0: i32, %arg1: memref<32x32xf32, #tpu.memory_space<vmem>>, %arg2: memref<10x32xf32, #tpu.memory_space<vmem>>, %arg3: memref<32x96xf32, #tpu.memory_space<vmem>>, %arg4: memref<32x32xf32, #tpu.memory_space<vmem>>, %arg5: memref<32x32xf32, #tpu.memory_space<vmem>>, %arg6: memref<32x32xf32, #tpu.memory_space<vmem>>, %arg7: memref<32x32xf32, #tpu.memory_space<vmem>>) attributes {dimension_semantics = [#tpu.dimension_semantics<parallel>], iteration_bounds = array<i64: 1>, scalar_prefetch = 0 : i64, scratch_operands = 0 : i64, tpu.core_type = #tpu.core_type<tc>, window_params = [{transform_indices = @transform_0, window_bounds = array<i64: 32, 32>}, {pipeline_mode = #tpu.pipeline_mode<synchronous>, transform_indices = @transform_1, window_bounds = array<i64: 10, 32>}, {pipeline_mode = #tpu.pipeline_mode<synchronous>, transform_indices = @transform_2, window_bounds = array<i64: 32, 96>}, {pipeline_mode = #tpu.pipeline_mode<synchronous>, transform_indices = @transform_3, window_bounds = array<i64: 32, 32>}, {pipeline_mode = #tpu.pipeline_mode<synchronous>, transform_indices = @transform_4, window_bounds = array<i64: 32, 32>}, {pipeline_mode = #tpu.pipeline_mode<synchronous>, transform_indices = @transform_5, window_bounds = array<i64: 32, 32>}, {transform_indices = @transform_6, window_bounds = array<i64: 32, 32>}]} {
    %c0 = arith.constant 0 : index
    %c0_0 = arith.constant 0 : index
    %0 = vector.load %arg1[%c0, %c0_0] : memref<32x32xf32, #tpu.memory_space<vmem>>, vector<32x32xf32>
    %c0_1 = arith.constant 0 : index
    %c0_2 = arith.constant 0 : index
    %1 = vector.load %arg2[%c0_1, %c0_2] : memref<10x32xf32, #tpu.memory_space<vmem>>, vector<10x32xf32>
    %2 = vector.extract_strided_slice %1 {offsets = [0, 0], sizes = [1, 32], strides = [1, 1]} : vector<10x32xf32> to vector<1x32xf32>
    %3 = vector.extract_strided_slice %1 {offsets = [1, 0], sizes = [1, 32], strides = [1, 1]} : vector<10x32xf32> to vector<1x32xf32>
    %4 = vector.extract_strided_slice %1 {offsets = [2, 0], sizes = [1, 32], strides = [1, 1]} : vector<10x32xf32> to vector<1x32xf32>
    %5 = vector.extract_strided_slice %1 {offsets = [3, 0], sizes = [1, 32], strides = [1, 1]} : vector<10x32xf32> to vector<1x32xf32>
    %6 = vector.extract_strided_slice %1 {offsets = [4, 0], sizes = [1, 32], strides = [1, 1]} : vector<10x32xf32> to vector<1x32xf32>
    %7 = vector.extract_strided_slice %1 {offsets = [5, 0], sizes = [1, 32], strides = [1, 1]} : vector<10x32xf32> to vector<1x32xf32>
    %8 = vector.extract_strided_slice %1 {offsets = [6, 0], sizes = [1, 32], strides = [1, 1]} : vector<10x32xf32> to vector<1x32xf32>
    %9 = vector.extract_strided_slice %1 {offsets = [7, 0], sizes = [1, 32], strides = [1, 1]} : vector<10x32xf32> to vector<1x32xf32>
    %10 = vector.extract_strided_slice %1 {offsets = [8, 0], sizes = [1, 32], strides = [1, 1]} : vector<10x32xf32> to vector<1x32xf32>
    %11 = vector.extract_strided_slice %1 {offsets = [9, 0], sizes = [1, 32], strides = [1, 1]} : vector<10x32xf32> to vector<1x32xf32>
    %cst = arith.constant dense<0.000000e+00> : vector<32xf32>
    %12 = vector.multi_reduction <add>, %0, %cst [1] : vector<32x32xf32> to vector<32xf32>
    %13 = vector.shape_cast %12 : vector<32xf32> to vector<32x1xf32>
    %cst_3 = arith.constant 3.200000e+01 : f32
    %14 = vector.broadcast %cst_3 : f32 to vector<32x1xf32>
    %15 = arith.divf %13, %14 : vector<32x1xf32>
    %16 = vector.broadcast %15 : vector<32x1xf32> to vector<32x32xf32>
    %17 = arith.subf %0, %16 : vector<32x32xf32>
    %18 = arith.mulf %17, %17 : vector<32x32xf32>
    %cst_4 = arith.constant dense<0.000000e+00> : vector<32xf32>
    %19 = vector.multi_reduction <add>, %18, %cst_4 [1] : vector<32x32xf32> to vector<32xf32>
    %20 = vector.shape_cast %19 : vector<32xf32> to vector<32x1xf32>
    %cst_5 = arith.constant 3.200000e+01 : f32
    %21 = vector.broadcast %cst_5 : f32 to vector<32x1xf32>
    %22 = arith.divf %20, %21 : vector<32x1xf32>
    %23 = vector.broadcast %15 : vector<32x1xf32> to vector<32x32xf32>
    %24 = arith.subf %0, %23 : vector<32x32xf32>
    %cst_6 = arith.constant 9.99999974E-6 : f32
    %25 = vector.broadcast %cst_6 : f32 to vector<32x1xf32>
    %26 = arith.addf %22, %25 : vector<32x1xf32>
    %27 = math.rsqrt %26 : vector<32x1xf32>
    %28 = vector.broadcast %27 : vector<32x1xf32> to vector<32x32xf32>
    %29 = arith.mulf %24, %28 : vector<32x32xf32>
    %30 = vector.broadcast %2 : vector<1x32xf32> to vector<32x32xf32>
    %31 = arith.mulf %29, %30 : vector<32x32xf32>
    %32 = vector.broadcast %3 : vector<1x32xf32> to vector<32x32xf32>
    %33 = arith.addf %31, %32 : vector<32x32xf32>
    %c0_7 = arith.constant 0 : index
    %c0_8 = arith.constant 0 : index
    %34 = vector.load %arg3[%c0_7, %c0_8] : memref<32x96xf32, #tpu.memory_space<vmem>>, vector<32x96xf32>
    %cst_9 = arith.constant dense<0.000000e+00> : vector<32x96xf32>
    %35 = tpu.matmul %33, %34, %cst_9 {dimension_numbers = #tpu.dot_dimension_numbers<[1], [0], [0], [1], [0, 0, 1, 1], [], []>} : vector<32x32xf32>, vector<32x96xf32>, vector<32x96xf32> -> vector<32x96xf32>
    %36 = vector.extract_strided_slice %35 {offsets = [0, 0], sizes = [32, 32], strides = [1, 1]} : vector<32x96xf32> to vector<32x32xf32>
    %37 = vector.broadcast %4 : vector<1x32xf32> to vector<32x32xf32>
    %38 = arith.addf %36, %37 : vector<32x32xf32>
    %39 = vector.shape_cast %38 : vector<32x32xf32> to vector<2x16x32xf32>
    %40 = vector.extract_strided_slice %35 {offsets = [0, 32], sizes = [32, 32], strides = [1, 1]} : vector<32x96xf32> to vector<32x32xf32>
    %41 = vector.broadcast %5 : vector<1x32xf32> to vector<32x32xf32>
    %42 = arith.addf %40, %41 : vector<32x32xf32>
    %43 = vector.shape_cast %42 : vector<32x32xf32> to vector<2x16x32xf32>
    %44 = vector.extract_strided_slice %35 {offsets = [0, 64], sizes = [32, 32], strides = [1, 1]} : vector<32x96xf32> to vector<32x32xf32>
    %45 = vector.broadcast %6 : vector<1x32xf32> to vector<32x32xf32>
    %46 = arith.addf %44, %45 : vector<32x32xf32>
    %47 = vector.shape_cast %46 : vector<32x32xf32> to vector<2x16x32xf32>
    %48 = vector.extract_strided_slice %39 {offsets = [0, 0, 0], sizes = [2, 16, 8], strides = [1, 1, 1]} : vector<2x16x32xf32> to vector<2x16x8xf32>
    %49 = vector.extract_strided_slice %43 {offsets = [0, 0, 0], sizes = [2, 16, 8], strides = [1, 1, 1]} : vector<2x16x32xf32> to vector<2x16x8xf32>
    %50 = vector.extract_strided_slice %47 {offsets = [0, 0, 0], sizes = [2, 16, 8], strides = [1, 1, 1]} : vector<2x16x32xf32> to vector<2x16x8xf32>
    "tpu.trace_start"() <{level = 10 : i32, message = "bqd,bkd->bqk"}> : () -> ()
    %cst_10 = arith.constant dense<0.000000e+00> : vector<2x16x16xf32>
    %51 = tpu.matmul %48, %49, %cst_10 {dimension_numbers = #tpu.dot_dimension_numbers<[2], [2], [1], [1], [0, 0, 0, 1, 1, 1], [0], [0]>} : vector<2x16x8xf32>, vector<2x16x8xf32>, vector<2x16x16xf32> -> vector<2x16x16xf32>
    "tpu.trace_stop"() : () -> ()
    %cst_11 = arith.constant 0.353553385 : f32
    %52 = vector.broadcast %cst_11 : f32 to vector<2x16x16xf32>
    %53 = arith.mulf %51, %52 : vector<2x16x16xf32>
    %cst_12 = arith.constant dense<0xFF800000> : vector<2x16xf32>
    %54 = vector.multi_reduction <maximumf>, %53, %cst_12 [2] : vector<2x16x16xf32> to vector<2x16xf32>
    %55 = vector.shape_cast %54 : vector<2x16xf32> to vector<2x16x1xf32>
    %56 = vector.broadcast %55 : vector<2x16x1xf32> to vector<2x16x16xf32>
    %57 = arith.subf %53, %56 : vector<2x16x16xf32>
    %58 = math.exp %57 : vector<2x16x16xf32>
    %cst_13 = arith.constant dense<0.000000e+00> : vector<2x16xf32>
    %59 = vector.multi_reduction <add>, %58, %cst_13 [2] : vector<2x16x16xf32> to vector<2x16xf32>
    %60 = vector.shape_cast %59 : vector<2x16xf32> to vector<2x16x1xf32>
    %61 = tpu.reciprocal %60 : vector<2x16x1xf32> -> vector<2x16x1xf32>
    %62 = vector.broadcast %61 : vector<2x16x1xf32> to vector<2x16x16xf32>
    %63 = arith.mulf %58, %62 : vector<2x16x16xf32>
    "tpu.trace_start"() <{level = 10 : i32, message = "bqk,bkd->bqd"}> : () -> ()
    %cst_14 = arith.constant dense<0.000000e+00> : vector<2x16x8xf32>
    %64 = tpu.matmul %63, %50, %cst_14 {dimension_numbers = #tpu.dot_dimension_numbers<[2], [1], [1], [2], [0, 0, 0, 1, 1, 2], [0], [0]>} : vector<2x16x16xf32>, vector<2x16x8xf32>, vector<2x16x8xf32> -> vector<2x16x8xf32>
    "tpu.trace_stop"() : () -> ()
    %65 = vector.extract_strided_slice %39 {offsets = [0, 0, 8], sizes = [2, 16, 8], strides = [1, 1, 1]} : vector<2x16x32xf32> to vector<2x16x8xf32>
    %66 = vector.extract_strided_slice %43 {offsets = [0, 0, 8], sizes = [2, 16, 8], strides = [1, 1, 1]} : vector<2x16x32xf32> to vector<2x16x8xf32>
    %67 = vector.extract_strided_slice %47 {offsets = [0, 0, 8], sizes = [2, 16, 8], strides = [1, 1, 1]} : vector<2x16x32xf32> to vector<2x16x8xf32>
    "tpu.trace_start"() <{level = 10 : i32, message = "bqd,bkd->bqk"}> : () -> ()
    %cst_15 = arith.constant dense<0.000000e+00> : vector<2x16x16xf32>
    %68 = tpu.matmul %65, %66, %cst_15 {dimension_numbers = #tpu.dot_dimension_numbers<[2], [2], [1], [1], [0, 0, 0, 1, 1, 1], [0], [0]>} : vector<2x16x8xf32>, vector<2x16x8xf32>, vector<2x16x16xf32> -> vector<2x16x16xf32>
    "tpu.trace_stop"() : () -> ()
    %cst_16 = arith.constant 0.353553385 : f32
    %69 = vector.broadcast %cst_16 : f32 to vector<2x16x16xf32>
    %70 = arith.mulf %68, %69 : vector<2x16x16xf32>
    %cst_17 = arith.constant dense<0xFF800000> : vector<2x16xf32>
    %71 = vector.multi_reduction <maximumf>, %70, %cst_17 [2] : vector<2x16x16xf32> to vector<2x16xf32>
    %72 = vector.shape_cast %71 : vector<2x16xf32> to vector<2x16x1xf32>
    %73 = vector.broadcast %72 : vector<2x16x1xf32> to vector<2x16x16xf32>
    %74 = arith.subf %70, %73 : vector<2x16x16xf32>
    %75 = math.exp %74 : vector<2x16x16xf32>
    %cst_18 = arith.constant dense<0.000000e+00> : vector<2x16xf32>
    %76 = vector.multi_reduction <add>, %75, %cst_18 [2] : vector<2x16x16xf32> to vector<2x16xf32>
    %77 = vector.shape_cast %76 : vector<2x16xf32> to vector<2x16x1xf32>
    %78 = tpu.reciprocal %77 : vector<2x16x1xf32> -> vector<2x16x1xf32>
    %79 = vector.broadcast %78 : vector<2x16x1xf32> to vector<2x16x16xf32>
    %80 = arith.mulf %75, %79 : vector<2x16x16xf32>
    "tpu.trace_start"() <{level = 10 : i32, message = "bqk,bkd->bqd"}> : () -> ()
    %cst_19 = arith.constant dense<0.000000e+00> : vector<2x16x8xf32>
    %81 = tpu.matmul %80, %67, %cst_19 {dimension_numbers = #tpu.dot_dimension_numbers<[2], [1], [1], [2], [0, 0, 0, 1, 1, 2], [0], [0]>} : vector<2x16x16xf32>, vector<2x16x8xf32>, vector<2x16x8xf32> -> vector<2x16x8xf32>
    "tpu.trace_stop"() : () -> ()
    %82 = vector.extract_strided_slice %39 {offsets = [0, 0, 16], sizes = [2, 16, 8], strides = [1, 1, 1]} : vector<2x16x32xf32> to vector<2x16x8xf32>
    %83 = vector.extract_strided_slice %43 {offsets = [0, 0, 16], sizes = [2, 16, 8], strides = [1, 1, 1]} : vector<2x16x32xf32> to vector<2x16x8xf32>
    %84 = vector.extract_strided_slice %47 {offsets = [0, 0, 16], sizes = [2, 16, 8], strides = [1, 1, 1]} : vector<2x16x32xf32> to vector<2x16x8xf32>
    "tpu.trace_start"() <{level = 10 : i32, message = "bqd,bkd->bqk"}> : () -> ()
    %cst_20 = arith.constant dense<0.000000e+00> : vector<2x16x16xf32>
    %85 = tpu.matmul %82, %83, %cst_20 {dimension_numbers = #tpu.dot_dimension_numbers<[2], [2], [1], [1], [0, 0, 0, 1, 1, 1], [0], [0]>} : vector<2x16x8xf32>, vector<2x16x8xf32>, vector<2x16x16xf32> -> vector<2x16x16xf32>
    "tpu.trace_stop"() : () -> ()
    %cst_21 = arith.constant 0.353553385 : f32
    %86 = vector.broadcast %cst_21 : f32 to vector<2x16x16xf32>
    %87 = arith.mulf %85, %86 : vector<2x16x16xf32>
    %cst_22 = arith.constant dense<0xFF800000> : vector<2x16xf32>
    %88 = vector.multi_reduction <maximumf>, %87, %cst_22 [2] : vector<2x16x16xf32> to vector<2x16xf32>
    %89 = vector.shape_cast %88 : vector<2x16xf32> to vector<2x16x1xf32>
    %90 = vector.broadcast %89 : vector<2x16x1xf32> to vector<2x16x16xf32>
    %91 = arith.subf %87, %90 : vector<2x16x16xf32>
    %92 = math.exp %91 : vector<2x16x16xf32>
    %cst_23 = arith.constant dense<0.000000e+00> : vector<2x16xf32>
    %93 = vector.multi_reduction <add>, %92, %cst_23 [2] : vector<2x16x16xf32> to vector<2x16xf32>
    %94 = vector.shape_cast %93 : vector<2x16xf32> to vector<2x16x1xf32>
    %95 = tpu.reciprocal %94 : vector<2x16x1xf32> -> vector<2x16x1xf32>
    %96 = vector.broadcast %95 : vector<2x16x1xf32> to vector<2x16x16xf32>
    %97 = arith.mulf %92, %96 : vector<2x16x16xf32>
    "tpu.trace_start"() <{level = 10 : i32, message = "bqk,bkd->bqd"}> : () -> ()
    %cst_24 = arith.constant dense<0.000000e+00> : vector<2x16x8xf32>
    %98 = tpu.matmul %97, %84, %cst_24 {dimension_numbers = #tpu.dot_dimension_numbers<[2], [1], [1], [2], [0, 0, 0, 1, 1, 2], [0], [0]>} : vector<2x16x16xf32>, vector<2x16x8xf32>, vector<2x16x8xf32> -> vector<2x16x8xf32>
    "tpu.trace_stop"() : () -> ()
    %99 = vector.extract_strided_slice %39 {offsets = [0, 0, 24], sizes = [2, 16, 8], strides = [1, 1, 1]} : vector<2x16x32xf32> to vector<2x16x8xf32>
    %100 = vector.extract_strided_slice %43 {offsets = [0, 0, 24], sizes = [2, 16, 8], strides = [1, 1, 1]} : vector<2x16x32xf32> to vector<2x16x8xf32>
    %101 = vector.extract_strided_slice %47 {offsets = [0, 0, 24], sizes = [2, 16, 8], strides = [1, 1, 1]} : vector<2x16x32xf32> to vector<2x16x8xf32>
    "tpu.trace_start"() <{level = 10 : i32, message = "bqd,bkd->bqk"}> : () -> ()
    %cst_25 = arith.constant dense<0.000000e+00> : vector<2x16x16xf32>
    %102 = tpu.matmul %99, %100, %cst_25 {dimension_numbers = #tpu.dot_dimension_numbers<[2], [2], [1], [1], [0, 0, 0, 1, 1, 1], [0], [0]>} : vector<2x16x8xf32>, vector<2x16x8xf32>, vector<2x16x16xf32> -> vector<2x16x16xf32>
    "tpu.trace_stop"() : () -> ()
    %cst_26 = arith.constant 0.353553385 : f32
    %103 = vector.broadcast %cst_26 : f32 to vector<2x16x16xf32>
    %104 = arith.mulf %102, %103 : vector<2x16x16xf32>
    %cst_27 = arith.constant dense<0xFF800000> : vector<2x16xf32>
    %105 = vector.multi_reduction <maximumf>, %104, %cst_27 [2] : vector<2x16x16xf32> to vector<2x16xf32>
    %106 = vector.shape_cast %105 : vector<2x16xf32> to vector<2x16x1xf32>
    %107 = vector.broadcast %106 : vector<2x16x1xf32> to vector<2x16x16xf32>
    %108 = arith.subf %104, %107 : vector<2x16x16xf32>
    %109 = math.exp %108 : vector<2x16x16xf32>
    %cst_28 = arith.constant dense<0.000000e+00> : vector<2x16xf32>
    %110 = vector.multi_reduction <add>, %109, %cst_28 [2] : vector<2x16x16xf32> to vector<2x16xf32>
    %111 = vector.shape_cast %110 : vector<2x16xf32> to vector<2x16x1xf32>
    %112 = tpu.reciprocal %111 : vector<2x16x1xf32> -> vector<2x16x1xf32>
    %113 = vector.broadcast %112 : vector<2x16x1xf32> to vector<2x16x16xf32>
    %114 = arith.mulf %109, %113 : vector<2x16x16xf32>
    "tpu.trace_start"() <{level = 10 : i32, message = "bqk,bkd->bqd"}> : () -> ()
    %cst_29 = arith.constant dense<0.000000e+00> : vector<2x16x8xf32>
    %115 = tpu.matmul %114, %101, %cst_29 {dimension_numbers = #tpu.dot_dimension_numbers<[2], [1], [1], [2], [0, 0, 0, 1, 1, 2], [0], [0]>} : vector<2x16x16xf32>, vector<2x16x8xf32>, vector<2x16x8xf32> -> vector<2x16x8xf32>
    "tpu.trace_stop"() : () -> ()
    %116 = tpu.concatenate %64, %81, %98, %115 in 2 : vector<2x16x8xf32>, vector<2x16x8xf32>, vector<2x16x8xf32>, vector<2x16x8xf32> -> vector<2x16x32xf32>
    %117 = vector.shape_cast %116 : vector<2x16x32xf32> to vector<32x32xf32>
    %c0_30 = arith.constant 0 : index
    %c0_31 = arith.constant 0 : index
    %118 = vector.load %arg4[%c0_30, %c0_31] : memref<32x32xf32, #tpu.memory_space<vmem>>, vector<32x32xf32>
    %cst_32 = arith.constant dense<0.000000e+00> : vector<32x32xf32>
    %119 = tpu.matmul %117, %118, %cst_32 {dimension_numbers = #tpu.dot_dimension_numbers<[1], [0], [0], [1], [0, 0, 1, 1], [], []>} : vector<32x32xf32>, vector<32x32xf32>, vector<32x32xf32> -> vector<32x32xf32>
    %120 = vector.broadcast %7 : vector<1x32xf32> to vector<32x32xf32>
    %121 = arith.addf %119, %120 : vector<32x32xf32>
    %122 = arith.addf %121, %0 : vector<32x32xf32>
    %cst_33 = arith.constant dense<0.000000e+00> : vector<32xf32>
    %123 = vector.multi_reduction <add>, %122, %cst_33 [1] : vector<32x32xf32> to vector<32xf32>
    %124 = vector.shape_cast %123 : vector<32xf32> to vector<32x1xf32>
    %cst_34 = arith.constant 3.200000e+01 : f32
    %125 = vector.broadcast %cst_34 : f32 to vector<32x1xf32>
    %126 = arith.divf %124, %125 : vector<32x1xf32>
    %127 = vector.broadcast %126 : vector<32x1xf32> to vector<32x32xf32>
    %128 = arith.subf %122, %127 : vector<32x32xf32>
    %129 = arith.mulf %128, %128 : vector<32x32xf32>
    %cst_35 = arith.constant dense<0.000000e+00> : vector<32xf32>
    %130 = vector.multi_reduction <add>, %129, %cst_35 [1] : vector<32x32xf32> to vector<32xf32>
    %131 = vector.shape_cast %130 : vector<32xf32> to vector<32x1xf32>
    %cst_36 = arith.constant 3.200000e+01 : f32
    %132 = vector.broadcast %cst_36 : f32 to vector<32x1xf32>
    %133 = arith.divf %131, %132 : vector<32x1xf32>
    %134 = vector.broadcast %126 : vector<32x1xf32> to vector<32x32xf32>
    %135 = arith.subf %122, %134 : vector<32x32xf32>
    %cst_37 = arith.constant 9.99999974E-6 : f32
    %136 = vector.broadcast %cst_37 : f32 to vector<32x1xf32>
    %137 = arith.addf %133, %136 : vector<32x1xf32>
    %138 = math.rsqrt %137 : vector<32x1xf32>
    %139 = vector.broadcast %138 : vector<32x1xf32> to vector<32x32xf32>
    %140 = arith.mulf %135, %139 : vector<32x32xf32>
    %141 = vector.broadcast %8 : vector<1x32xf32> to vector<32x32xf32>
    %142 = arith.mulf %140, %141 : vector<32x32xf32>
    %143 = vector.broadcast %9 : vector<1x32xf32> to vector<32x32xf32>
    %144 = arith.addf %142, %143 : vector<32x32xf32>
    %c0_38 = arith.constant 0 : index
    %c0_39 = arith.constant 0 : index
    %145 = vector.load %arg5[%c0_38, %c0_39] : memref<32x32xf32, #tpu.memory_space<vmem>>, vector<32x32xf32>
    %cst_40 = arith.constant dense<0.000000e+00> : vector<32x32xf32>
    %146 = tpu.matmul %144, %145, %cst_40 {dimension_numbers = #tpu.dot_dimension_numbers<[1], [0], [0], [1], [0, 0, 1, 1], [], []>} : vector<32x32xf32>, vector<32x32xf32>, vector<32x32xf32> -> vector<32x32xf32>
    %147 = vector.broadcast %10 : vector<1x32xf32> to vector<32x32xf32>
    %148 = arith.addf %146, %147 : vector<32x32xf32>
    %cst_41 = arith.constant 5.000000e-01 : f32
    %149 = vector.broadcast %cst_41 : f32 to vector<32x32xf32>
    %150 = arith.mulf %149, %148 : vector<32x32xf32>
    %cst_42 = arith.constant 0.707106769 : f32
    %151 = vector.broadcast %cst_42 : f32 to vector<32x32xf32>
    %152 = arith.mulf %148, %151 : vector<32x32xf32>
    %153 = math.erf %152 : vector<32x32xf32>
    %cst_43 = arith.constant 1.000000e+00 : f32
    %154 = vector.broadcast %cst_43 : f32 to vector<32x32xf32>
    %155 = arith.addf %154, %153 : vector<32x32xf32>
    %156 = arith.mulf %150, %155 : vector<32x32xf32>
    %c0_44 = arith.constant 0 : index
    %c0_45 = arith.constant 0 : index
    %157 = vector.load %arg6[%c0_44, %c0_45] : memref<32x32xf32, #tpu.memory_space<vmem>>, vector<32x32xf32>
    %cst_46 = arith.constant dense<0.000000e+00> : vector<32x32xf32>
    %158 = tpu.matmul %156, %157, %cst_46 {dimension_numbers = #tpu.dot_dimension_numbers<[1], [0], [0], [1], [0, 0, 1, 1], [], []>} : vector<32x32xf32>, vector<32x32xf32>, vector<32x32xf32> -> vector<32x32xf32>
    %159 = vector.broadcast %11 : vector<1x32xf32> to vector<32x32xf32>
    %160 = arith.addf %158, %159 : vector<32x32xf32>
    %161 = arith.addf %160, %122 : vector<32x32xf32>
    %c0_47 = arith.constant 0 : index
    %c0_48 = arith.constant 0 : index
    %162 = vector.load %arg7[%c0_47, %c0_48] : memref<32x32xf32, #tpu.memory_space<vmem>>, vector<32x32xf32>
    tpu.vector_store %arg7[%c0_47, %c0_48], %161 {strides = array<i32>} : memref<32x32xf32, #tpu.memory_space<vmem>>, vector<32x32xf32>,
    return
  }
  func.func @transform_0(%arg0: i32) -> (i32, i32) {
    %c0_i32 = arith.constant 0 : i32
    %c0_i32_0 = arith.constant 0 : i32
    return %arg0, %c0_i32 : i32, i32
  }
  func.func @transform_1(%arg0: i32) -> (i32, i32) {
    %c0_i32 = arith.constant 0 : i32
    %c0_i32_0 = arith.constant 0 : i32
    %c0_i32_1 = arith.constant 0 : i32
    return %c0_i32, %c0_i32_0 : i32, i32
  }
  func.func @transform_2(%arg0: i32) -> (i32, i32) {
    %c0_i32 = arith.constant 0 : i32
    %c0_i32_0 = arith.constant 0 : i32
    %c0_i32_1 = arith.constant 0 : i32
    return %c0_i32, %c0_i32_0 : i32, i32
  }
  func.func @transform_3(%arg0: i32) -> (i32, i32) {
    %c0_i32 = arith.constant 0 : i32
    %c0_i32_0 = arith.constant 0 : i32
    %c0_i32_1 = arith.constant 0 : i32
    return %c0_i32, %c0_i32_0 : i32, i32
  }
  func.func @transform_4(%arg0: i32) -> (i32, i32) {
    %c0_i32 = arith.constant 0 : i32
    %c0_i32_0 = arith.constant 0 : i32
    %c0_i32_1 = arith.constant 0 : i32
    return %c0_i32, %c0_i32_0 : i32, i32
  }
  func.func @transform_5(%arg0: i32) -> (i32, i32) {
    %c0_i32 = arith.constant 0 : i32
    %c0_i32_0 = arith.constant 0 : i32
    %c0_i32_1 = arith.constant 0 : i32
    return %c0_i32, %c0_i32_0 : i32, i32
  }
  func.func @transform_6(%arg0: i32) -> (i32, i32) {
    %c0_i32 = arith.constant 0 : i32
    %c0_i32_0 = arith.constant 0 : i32
    return %arg0, %c0_i32 : i32, i32
  }
}

</mosaic_0001>

<bundles_post_ra>
// kernel: tpu_custom_call.1
= control target key start
LH: loop header
LB: loop body
LE: loop exit
PB: predicated region body
PF: predicated region fallthrough
CT: control target
= control target key end

     0   :  { %11 = vsyncpa [#allocation3], 0  ;;  %s3716_s0 = inlined_call_operand.hbm [shape: f32[32,32], index: 0, kind: input, shape index: {}]   ;;  %s3717_s1 = inlined_call_operand.hbm [shape: f32[10,32], index: 1, kind: input, shape index: {}]   ;;  %s3718_s2 = inlined_call_operand.hbm [shape: f32[32,96], index: 2, kind: input, shape index: {}]   ;;  %s3719_s3 = inlined_call_operand.hbm [shape: f32[32,32], index: 3, kind: input, shape index: {}]   ;;  %s3720_s4 = inlined_call_operand.hbm [shape: f32[32,32], index: 4, kind: input, shape index: {}]   ;;  %s3721_s5 = inlined_call_operand.hbm [shape: f32[32,32], index: 5, kind: input, shape index: {}]   ;;  %s3722_s6 = inlined_call_operand.hbm [shape: f32[32,32], index: 6, kind: output, shape index: {}]  }
   0x1   :  { %12 = vsyncpa [#allocation6], 0 }
   0x2   :  { %13 = vsyncpa [#allocation9], 0 }
   0x3   :  { %14 = vsyncpa [#allocation12], 0 }
   0x4   :  { %15 = vsyncpa [#allocation4], 0  ;;  %s3233_s21 = smov [#allocation5]   ;;  %s3234_s23 = smov [#allocation8]  }
   0x5   :  { %s33_s22 = sshll.u32 %s3233_s21, 4  ;;  %s57_s24 = sshll.u32 %s3234_s23, 4  ;;  %s34_s22 = int_to_ptr.vmem [resolvable:$true] %s33_s22  ;;  %s3291_s24 = int_to_ptr.vmem [resolvable:$true] %s57_s24 }
   0x6   :  { %s3069_s27 = scalar_lea.hbm %s3717_s1, 256 }
   0x7   :  { %p3070_p0 = scmp.ne.s32.totalorder %s3717_s1, %s3069_s27  ;;  %p3073_p1 = scmp.lt.u32.totalorder %s3069_s27, %s3717_s1 }
   0x9   :  { %p3075_p2 = pnand %p3073_p1, %p3070_p0 }
   0xb   :  { %3078 = shalt.err (!%p3075_p2)
}
   0xc   :  { %s3079_s8 = scalar_lea.vmem %s34_s22, 256  ;;  %p3084_p4 = scmp.lt.s32.totalorder %s34_s22, %s34_s22 }
   0xd   :  { %p3080_p3 = scmp.ne.s32.totalorder %s34_s22, %s3079_s8  ;;  %p3085_p5 = scmp.lt.s32.totalorder %s3079_s8, %s3079_s8 }
   0xf   :  { %p3086_p6 = por %p3085_p5, %p3084_p4 }
  0x11   :  { %p3087_p7 = pnand %p3086_p6, %p3080_p3 }
  0x13   :  { %3090 = shalt.err (!%p3087_p7)
}
  0x14   :  { %s3235_s9 = smov 128   ;;  %s3236_s10 = smov 8  }
  0x15   :  { %39 = dma.hbm_to_vmem [thread:$0]  %s3717_s1, 256, %s34_s22, [#allocation6], %s3235_s9, %s3235_s9, %s3236_s10  }
  0x16   :  { %s3091_s15 = scalar_lea.hbm %s3719_s3, 512 }
  0x17   :  { %p3092_p8 = scmp.ne.s32.totalorder %s3719_s3, %s3091_s15  ;;  %p3095_p9 = scmp.lt.u32.totalorder %s3091_s15, %s3719_s3 }
  0x19   :  { %p3097_p10 = pnand %p3095_p9, %p3092_p8 }
  0x1b   :  { %3100 = shalt.err (!%p3097_p10)
}
  0x1c   :  { %s3101_s20 = scalar_lea.vmem %s3291_s24, 512  ;;  %p3106_p12 = scmp.lt.s32.totalorder %s3291_s24, %s3291_s24 }
  0x1d   :  { %p3102_p11 = scmp.ne.s32.totalorder %s3291_s24, %s3101_s20  ;;  %p3107_p13 = scmp.lt.s32.totalorder %s3101_s20, %s3101_s20 }
  0x1f   :  { %p3108_p0 = por %p3107_p13, %p3106_p12 }
  0x21   :  { %p3109_p1 = pnand %p3108_p0, %p3102_p11 }
  0x23   :  { %3112 = shalt.err (!%p3109_p1)
}
  0x24   :  { %63 = dma.hbm_to_vmem [thread:$0]  %s3719_s3, 512, %s3291_s24, [#allocation9], %s3235_s9, %s3235_s9, %s3236_s10  }
  0x25   :  { %s3237_s22 = smov [#allocation2]   ;;  %s3238_s25 = smov [#allocation7]  }
  0x26   :  { %s21_s23 = sshll.u32 %s3237_s22, 4  ;;  %s45_s26 = sshll.u32 %s3238_s25, 4  ;;  %s22_s23 = int_to_ptr.vmem [resolvable:$true] %s21_s23  ;;  %s3328_s26 = int_to_ptr.vmem [resolvable:$true] %s45_s26 }
  0x27   :  { %s3113_s29 = scalar_lea.hbm %s3716_s0, 512 }
  0x28   :  { %p3114_p2 = scmp.ne.s32.totalorder %s3716_s0, %s3113_s29  ;;  %p3117_p3 = scmp.lt.u32.totalorder %s3113_s29, %s3716_s0 }
  0x2a   :  { %p3119_p4 = pnand %p3117_p3, %p3114_p2 }
  0x2c   :  { %3122 = shalt.err (!%p3119_p4)
}
  0x2d   :  { %s3123_s3 = scalar_lea.vmem %s22_s23, 512  ;;  %p3128_p6 = scmp.lt.s32.totalorder %s22_s23, %s22_s23 }
  0x2e   :  { %p3124_p5 = scmp.ne.s32.totalorder %s22_s23, %s3123_s3  ;;  %p3129_p7 = scmp.lt.s32.totalorder %s3123_s3, %s3123_s3 }
  0x30   :  { %p3130_p8 = por %p3129_p7, %p3128_p6 }
  0x32   :  { %p3131_p9 = pnand %p3130_p8, %p3124_p5 }
  0x34   :  { %3134 = shalt.err (!%p3131_p9)
}
  0x35   :  { %27 = dma.hbm_to_vmem [thread:$0]  %s3716_s0, 512, %s22_s23, [#allocation3], %s3235_s9, %s3235_s9, %s3236_s10  }
  0x36   :  { %s3135_s15 = scalar_lea.hbm %s3718_s2, 512 }
  0x37   :  { %p3136_p10 = scmp.ne.s32.totalorder %s3718_s2, %s3135_s15  ;;  %p3139_p11 = scmp.lt.u32.totalorder %s3135_s15, %s3718_s2 }
  0x39   :  { %p3141_p12 = pnand %p3139_p11, %p3136_p10 }
  0x3b   :  { %3144 = shalt.err (!%p3141_p12)
}
  0x3c   :  { %s3145_s20 = scalar_lea.vmem %s3328_s26, 512  ;;  %p3150_p0 = scmp.lt.s32.totalorder %s3328_s26, %s3328_s26 }
  0x3d   :  { %p3146_p13 = scmp.ne.s32.totalorder %s3328_s26, %s3145_s20  ;;  %p3151_p1 = scmp.lt.s32.totalorder %s3145_s20, %s3145_s20 }
  0x3f   :  { %p3152_p2 = por %p3151_p1, %p3150_p0 }
  0x41   :  { %p3153_p3 = pnand %p3152_p2, %p3146_p13 }
  0x43   :  { %3156 = shalt.err (!%p3153_p3)
}
  0x44   :  { %51 = dma.hbm_to_vmem [thread:$0]  %s3718_s2, 512, %s3328_s26, [#allocation6], %s3235_s9, %s3235_s9, %s3236_s10  }
  0x45   :  { %s3239_s21 = smov [#allocation10]   ;;  %s3240_s23 = smov [#allocation11]  }
  0x46   :  { %s69_s22 = sshll.u32 %s3239_s21, 4  ;;  %s81_s25 = sshll.u32 %s3240_s23, 4  ;;  %s70_s22 = int_to_ptr.vmem [resolvable:$true] %s69_s22  ;;  %s3365_s25 = int_to_ptr.vmem [resolvable:$true] %s81_s25 }
  0x47   :  { %s3157_s29 = scalar_lea.hbm %s3720_s4, 512 }
  0x48   :  { %p3158_p4 = scmp.ne.s32.totalorder %s3720_s4, %s3157_s29  ;;  %p3161_p5 = scmp.lt.u32.totalorder %s3157_s29, %s3720_s4 }
  0x4a   :  { %p3163_p6 = pnand %p3161_p5, %p3158_p4 }
  0x4c   :  { %3166 = shalt.err (!%p3163_p6)
}
  0x4d   :  { %s3167_s2 = scalar_lea.vmem %s70_s22, 512  ;;  %p3172_p8 = scmp.lt.s32.totalorder %s70_s22, %s70_s22 }
  0x4e   :  { %p3168_p7 = scmp.ne.s32.totalorder %s70_s22, %s3167_s2  ;;  %p3173_p9 = scmp.lt.s32.totalorder %s3167_s2, %s3167_s2 }
  0x50   :  { %p3174_p10 = por %p3173_p9, %p3172_p8 }
  0x52   :  { %p3175_p11 = pnand %p3174_p10, %p3168_p7 }
  0x54   :  { %3178 = shalt.err (!%p3175_p11)
}
  0x55   :  { %75 = dma.hbm_to_vmem [thread:$0]  %s3720_s4, 512, %s70_s22, [#allocation9], %s3235_s9, %s3235_s9, %s3236_s10  }
  0x56   :  { %s3179_s13 = scalar_lea.hbm %s3721_s5, 512 }
  0x57   :  { %p3180_p12 = scmp.ne.s32.totalorder %s3721_s5, %s3179_s13  ;;  %p3183_p13 = scmp.lt.u32.totalorder %s3179_s13, %s3721_s5 }
  0x59   :  { %p3185_p0 = pnand %p3183_p13, %p3180_p12 }
  0x5b   :  { %3188 = shalt.err (!%p3185_p0)
}
  0x5c   :  { %s3189_s18 = scalar_lea.vmem %s3365_s25, 512  ;;  %p3194_p2 = scmp.lt.s32.totalorder %s3365_s25, %s3365_s25 }
  0x5d   :  { %p3190_p1 = scmp.ne.s32.totalorder %s3365_s25, %s3189_s18  ;;  %p3195_p3 = scmp.lt.s32.totalorder %s3189_s18, %s3189_s18 }
  0x5f   :  { %p3196_p4 = por %p3195_p3, %p3194_p2 }
  0x61   :  { %p3197_p5 = pnand %p3196_p4, %p3190_p1 }
  0x63   :  { %3200 = shalt.err (!%p3197_p5)
}
  0x64   :  { %87 = dma.hbm_to_vmem [thread:$0]  %s3721_s5, 512, %s3365_s25, [#allocation12], %s3235_s9, %s3235_s9, %s3236_s10  }
  0x65   :  { %3223 = dma.done.wait [#allocation3], 512  }
  0x66   :  { %3224 = vsyncadd [#allocation3], 4294966784 }
  0x67   :  { %3225 = dma.done.wait [#allocation6], 768  }
  0x68   :  { %3226 = vsyncadd [#allocation6], 4294966528 }
  0x69   :  { %3227 = dma.done.wait [#allocation9], 1024  }
  0x6a   :  { %3228 = vsyncadd [#allocation9], 4294966272 }
  0x6b   :  { %3229 = dma.done.wait [#allocation12], 512  }
  0x6c   :  { %3230 = vsyncadd [#allocation12], 4294966784  ;;  %vm112_vm0 = vcmask 261120   ;;  %v106_v0 = vld [vmem:[#allocation2] sm:$0xff]  ;;  %v108_v1 = vld [vmem:[#allocation2 + $0x10] sm:$0xff]  ;;  %v166_v34 = vlaneseq  ;;  %s3241_s5 = smov 32  }
  0x6d   :  { %v107_v2 = vld [vmem:[#allocation2 + $0x8] sm:$0xff]  ;;  %v113_v3 = vsel %vm112_vm0, %v106_v0, 0.0  ;;  %v119_v4 = vsel %vm112_vm0, %v108_v1, 0.0  ;;  %v109_v5 = vld [vmem:[#allocation2 + $0x18] sm:$0xff]  ;;  %v182_v28 = vld [vmem:[#allocation7] sm:$0xff]  ;;  %vm321_vm1 = vcmask 64512  }
  0x6e   :  { %114 = vadd.xlane.f32.xlu0 %v113_v3  ;;  %120 = vadd.xlane.f32.xlu1 %v119_v4  ;;  %v116_v6 = vsel %vm112_vm0, %v107_v2, 0.0  ;;  %v122_v7 = vsel %vm112_vm0, %v109_v5, 0.0  ;;  %v183_v29 = vld [vmem:[#allocation7 + $0x8] sm:$0xff]  ;;  %v184_v30 = vld [vmem:[#allocation7 + $0x10] sm:$0xff]  ;;  %v185_v32 = vld [vmem:[#allocation7 + $0x18] sm:$0xff]  ;;  %v3414_v35 = vshrl.u32 %v166_v34, 7 }
  0x6f   :  { %v2761_v31 = vpack.c.bf16 %v183_v29, %v182_v28  ;;  %v2765_v33 = vpack.c.bf16 %v185_v32, %v184_v30  ;;  %v3417_v37 = vld [vmem:[#allocation5] sm:$0xff]  ;;  %s3242_s20 = smov 96   ;;  %vm3459_vm2 = vmpackc.low %vm321_vm1, %vm321_vm1  ;;  %vm502_vm3 = vcmask 130048   ;;  %s3243_s0 = smov 64   ;;  %vm1993_vm4 = vcmask 195584  }
  0x70   :  { %v293_v36 = vsub.s32 3, %v3414_v35  ;;  %v168_v50 = vsub.s32 0, %v3414_v35  ;;  %v176_v52 = vsub.s32 1, %v3414_v35  ;;  %s3244_s1 = smov 88   ;;  %s3245_s21 = smov 120  }
  0x71   :  { %2762 = vmatprep.subr.bf16.mxu0 %v2761_v31  ;;  %s3246_s22 = smov 56   ;;  %s3247_s23 = smov 80  }
  0x72   :  { %117 = vadd.xlane.f32.xlu0 %v116_v6  ;;  %123 = vadd.xlane.f32.xlu1 %v122_v7  ;;  %v294_v38 = vrot.slane %v3417_v37, %v293_v36  ;;  %v169_v53 = vrot.slane %v3417_v37, %v168_v50  ;;  %v177_v56 = vrot.slane %v3417_v37, %v176_v52  ;;  %v285_v7 = vsub.s32 2, %v3414_v35  ;;  %s3248_s25 = smov 112   ;;  %s3249_s27 = smov 48  }
  0x73   :  { %2764 = vmatpush3.bf16.msra.mxu0 %v2761_v31  ;;  %s3250_s28 = smov 72   ;;  %s3251_s29 = smov 104  }
  0x74   :  { %2766 = vmatprep.subr.bf16.mxu0 %v2765_v33  ;;  %s3252_s30 = smov 40   ;;  %s3253_s7 = smov 16  }
  0x75   :  { %s3254_s8 = smov 24   ;;  %s3255_s11 = smov [#allocation13]  }
  0x76   :  { %s2418_s2 = sshll.u32 %s3255_s11, 4  ;;  %s2419_s2 = int_to_ptr.vmem [resolvable:$true] %s2418_s2 }
  0x77   :  { %2768 = vmatpush3.bf16.msra.mxu0 %v2765_v33  ;;  %s3201_s26 = scalar_lea.vmem %s2419_s2, 512  ;;  %p3206_p7 = scmp.lt.s32.totalorder %s2419_s2, %s2419_s2 }
  0x78   :  { %p3202_p6 = scmp.ne.s32.totalorder %s2419_s2, %s3201_s26  ;;  %p3207_p8 = scmp.lt.s32.totalorder %s3201_s26, %s3201_s26 }
  0x7a   :  { %p3208_p9 = por %p3207_p8, %p3206_p7 }
  0x7c   :  { %p3209_p10 = pnand %p3208_p9, %p3202_p6 }
  0xfb   :  { %v115_v8 = vpop.xlane.xlu0 %114  ;;  %v121_v9 = vpop.xlane.xlu1 %120 }
  0xfc   :  { %v126_v10 = vmul.f32 0.03125, %v115_v8  ;;  %v128_v11 = vmul.f32 0.03125, %v121_v9  ;;  %v286_v8 = vrot.slane %v3417_v37, %v285_v7 }
  0xfe   :  { %v130_v12 = vsub.f32 %v106_v0, %v126_v10  ;;  %v3406_v13 = vsub.f32 %v108_v1, %v128_v11 }
  0xff   :  { %v118_v14 = vpop.xlane.xlu0 %117  ;;  %v124_v15 = vpop.xlane.xlu1 %123 }
 0x100   :  { %v127_v16 = vmul.f32 0.03125, %v118_v14  ;;  %v129_v17 = vmul.f32 0.03125, %v124_v15  ;;  %v134_v18 = vmul.f32 %v130_v12, %v130_v12  ;;  %v136_v19 = vmul.f32 %v3406_v13, %v3406_v13 }
 0x102   :  { %v131_v20 = vsub.f32 %v107_v2, %v127_v16  ;;  %v133_v21 = vsub.f32 %v109_v5, %v129_v17  ;;  %v138_v22 = vsel %vm112_vm0, %v134_v18, 0.0  ;;  %v144_v23 = vsel %vm112_vm0, %v136_v19, 0.0 }
 0x103   :  { %139 = vadd.xlane.f32.xlu0 %v138_v22 }
 0x104   :  { %v135_v24 = vmul.f32 %v131_v20, %v131_v20  ;;  %v137_v25 = vmul.f32 %v133_v21, %v133_v21 }
 0x106   :  { %v141_v26 = vsel %vm112_vm0, %v135_v24, 0.0  ;;  %v147_v27 = vsel %vm112_vm0, %v137_v25, 0.0 }
 0x107   :  { %145 = vadd.xlane.f32.xlu0 %v144_v23  ;;  %142 = vadd.xlane.f32.xlu1 %v141_v26 }
 0x10b   :  { %148 = vadd.xlane.f32.xlu1 %v147_v27 }
 0x11d   :  { %296 = vrot.lane.b32.xlu0 %v294_v38, %s3241_s5 }
 0x190   :  { %v140_v39 = vpop.xlane.xlu0 %139 }
 0x191   :  { %v150_v40 = vmul.f32 0.03125, %v140_v39 }
 0x193   :  { %v154_v41 = vadd.f32 1e-05, %v150_v40 }
 0x194   :  { %v143_v42 = vpop.xlane.xlu1 %142  ;;  %v146_v43 = vpop.xlane.xlu0 %145 }
 0x195   :  { %2976 = vrsqrt.f32 %v154_v41  ;;  %v151_v44 = vmul.f32 0.03125, %v143_v42  ;;  %v152_v45 = vmul.f32 0.03125, %v146_v43 }
 0x197   :  { %v155_v46 = vadd.f32 1e-05, %v151_v44  ;;  %v156_v47 = vadd.f32 1e-05, %v152_v45 }
 0x198   :  { %v149_v48 = vpop.xlane.xlu1 %148  ;;  %v297_v9 = vpop.permute.xlu0 %296 }
 0x199   :  { %2978 = vrsqrt.f32 %v155_v46  ;;  %v153_v49 = vmul.f32 0.03125, %v149_v48 }
 0x19a   :  { %2980 = vrsqrt.f32 %v156_v47  ;;  %v305_v47 = vsub.s32 4, %v3414_v35 }
 0x19b   :  { %v157_v51 = vadd.f32 1e-05, %v153_v49 }
 0x19c   :  { %v306_v48 = vrot.slane %v3417_v37, %v305_v47 }
 0x19d   :  { %2982 = vrsqrt.f32 %v157_v51 }
 0x19f   :  { %v2977_v54 = vpop.eup %2976 }
 0x1a0   :  { %v162_v55 = vmul.f32 %v2977_v54, %v130_v12 }
 0x1a2   :  { %v170_v57 = vmul.f32 %v169_v53, %v162_v55 }
 0x1a3   :  { %v2979_v58 = vpop.eup %2978 }
 0x1a4   :  { %v2981_v59 = vpop.eup %2980  ;;  %v178_v60 = vadd.f32 %v177_v56, %v170_v57  ;;  %v163_v61 = vmul.f32 %v2979_v58, %v131_v20 }
 0x1a5   :  { %v164_v62 = vmul.f32 %v2981_v59, %v3406_v13 }
 0x1a6   :  { %2601 = vmatprep.mubr.msk.f32.mxu0 %vm112_vm0, %v178_v60  ;;  %v171_v63 = vmul.f32 %v169_v53, %v163_v61 }
 0x1a7   :  { %v2983_v0 = vpop.eup %2982  ;;  %v172_v1 = vmul.f32 %v169_v53, %v164_v62 }
 0x1a8   :  { %v179_v2 = vadd.f32 %v177_v56, %v171_v63  ;;  %v165_v3 = vmul.f32 %v2983_v0, %v133_v21 }
 0x1a9   :  { %v180_v4 = vadd.f32 %v177_v56, %v172_v1 }
 0x1aa   :  { %2602 = vmatmul.mubr.msk.f32.vlgmr.msra.gmra.mrb[0].mxu0 %vm112_vm0, %v179_v2  ;;  %v173_v5 = vmul.f32 %v169_v53, %v165_v3 }
 0x1ab   :  { %2604 = vmatprep.mubr.msk.f32.mxu0 %vm112_vm0, %v180_v4 }
 0x1ac   :  { %v181_v6 = vadd.f32 %v177_v56, %v173_v5 }
 0x1ae   :  { %2605 = vmatmul.mubr.msk.f32.gmra.mrb[2].mxu0 %vm112_vm0, %v181_v6 }
 0x27d   :  { %v3435_v10 = vpop.f32.mrb[0].mxu0 }
 0x27e   :  { %v3438_v11 = vadd.f32 %v3435_v10, %v286_v8  ;;  %v300_v12 = vadd.f32 %v3435_v10, %v297_v9  ;;  %v264_v13 = vpop.f32.mrb[1].mxu0 }
 0x27f   :  { %v3441_v14 = vadd.f32 %v286_v8, %v264_v13  ;;  %v299_v15 = vadd.f32 %v297_v9, %v264_v13 }
 0x281   :  { %v2606_v16 = vpop.f32.mrb[2].mxu0  ;;  %2611 = vmatprep.mubr.msk.f32.mxu1 %vm321_vm1, %v3441_v14  ;;  %v3445_v17 = vpack.i.bf16 %v300_v12, %v299_v15 }
 0x282   :  { %v3447_v18 = vadd.f32 %v2606_v16, %v286_v8  ;;  %v302_v19 = vadd.f32 %v2606_v16, %v297_v9  ;;  %v274_v20 = vpop.f32.mrb[3].mxu0 }
 0x283   :  { %v3449_v21 = vadd.f32 %v286_v8, %v274_v20  ;;  %v301_v22 = vadd.f32 %v297_v9, %v274_v20  ;;  %2897 = vrot.lane.b32.xlu1 %v3445_v17, %s3242_s20 }
 0x285   :  { %2618 = vmatprep.mubr.msk.f32.mxu0 %vm321_vm1, %v3449_v21  ;;  %v3454_v23 = vpack.i.bf16 %v302_v19, %v301_v22 }
 0x287   :  { %2902 = vrot.lane.b32.xlu1 %v3454_v23, %s3242_s20 }
 0x2f5   :  { %v2898_v24 = vpop.permute.xlu1 %2897 }
 0x2f6   :  { %v2900_v25 = vunpack.i.h.bf16 %v2898_v24  ;;  %v2899_v26 = vunpack.i.l.bf16 %v2898_v24 }
 0x2f8   :  { %v2769_v28 = vpack.c.bf16 %v2900_v25, %v2899_v26 }
 0x2f9   :  { %v2903_v29 = vpop.permute.xlu1 %2902 }
 0x2fa   :  { %v2905_v30 = vunpack.i.h.bf16 %v2903_v29  ;;  %v2904_v31 = vunpack.i.l.bf16 %v2903_v29  ;;  %2771 = vmatprep.subr.msk.bf16.mxu1 %vm3459_vm2, %v2769_v28 }
 0x2fb   :  { %2774 = vmatpush3.bf16.xpose.msk.msra.mxu1 %vm3459_vm2, %v2769_v28 }
 0x2fc   :  { %v2775_v32 = vpack.c.bf16 %v2905_v30, %v2904_v31 }
 0x2fe   :  { %2777 = vmatprep.subr.msk.bf16.mxu0 %vm3459_vm2, %v2775_v32 }
 0x2ff   :  { %2780 = vmatpush3.bf16.xpose.msk.msra.mxu0 %vm3459_vm2, %v2775_v32 }
 0x302   :  { %2612 = vmatmul.mubr.msk.f32.vlgmr.msra.gmra.mrb[0].mxu1 %vm321_vm1, %v3438_v11 }
 0x306   :  { %2619 = vmatmul.mubr.msk.f32.vlgmr.msra.gmra.mrb[4].mxu0 %vm321_vm1, %v3447_v18 }
 0x3d5   :  { %v2613_v33 = vpop.f32.mrb[0].mxu1 }
 0x3d6   :  { %v499_v34 = vmul.f32 0.35355338, %v2613_v33  ;;  %v398_v36 = vpop.f32.mrb[1].mxu1 }
 0x3d7   :  { %v498_v38 = vmul.f32 0.35355338, %v398_v36 }
 0x3d8   :  { %v506_v39 = vsel %vm502_vm3, %v499_v34, -inf }
 0x3d9   :  { %v2620_v40 = vpop.f32.mrb[4].mxu0  ;;  %507 = vmax.xlane.f32.xlu0 %v506_v39  ;;  %v503_v41 = vsel %vm502_vm3, %v498_v38, -inf }
 0x3da   :  { %v489_v42 = vpop.f32.mrb[5].mxu0  ;;  %504 = vmax.xlane.f32.xlu1 %v503_v41  ;;  %v501_v44 = vmul.f32 0.35355338, %v2620_v40 }
 0x3db   :  { %v500_v43 = vmul.f32 0.35355338, %v489_v42 }
 0x3dc   :  { %v512_v46 = vsel %vm502_vm3, %v501_v44, -inf }
 0x3dd   :  { %v509_v45 = vsel %vm502_vm3, %v500_v43, -inf }
 0x3de   :  { %510 = vmax.xlane.f32.xlu0 %v509_v45 }
 0x3e2   :  { %513 = vmax.xlane.f32.xlu0 %v512_v46 }
 0x3eb   :  { %308 = vrot.lane.b32.xlu1 %v306_v48, %s3243_s0 }
 0x466   :  { %v508_v49 = vpop.xlane.xlu0 %507 }
 0x467   :  { %v516_v51 = vsub.f32 %v499_v34, %v508_v49  ;;  %v505_v53 = vpop.xlane.xlu1 %504 }
 0x468   :  { %v515_v54 = vsub.f32 %v498_v38, %v505_v53 }
 0x469   :  { %v521_v55 = vmul.f32 1.442695, %v516_v51 }
 0x46a   :  { %v519_v56 = vmul.f32 1.442695, %v515_v54 }
 0x46b   :  { %2984 = vpow2.f32 %v521_v55  ;;  %v511_v57 = vpop.xlane.xlu0 %510  ;;  %v309_v58 = vpop.permute.xlu1 %308 }
 0x46c   :  { %v311_v59 = vadd.f32 %v309_v58, %v264_v13  ;;  %v312_v60 = vadd.f32 %v3435_v10, %v309_v58  ;;  %2986 = vpow2.f32 %v519_v56  ;;  %v313_v61 = vadd.f32 %v309_v58, %v274_v20 }
 0x46d   :  { %v314_v62 = vadd.f32 %v2606_v16, %v309_v58  ;;  %v517_v63 = vsub.f32 %v500_v43, %v511_v57 }
 0x46e   :  { %v3483_v37 = vpack.i.bf16 %v312_v60, %v311_v59 }
 0x46f   :  { %v514_v0 = vpop.xlane.xlu0 %513  ;;  %v3485_v1 = vpack.i.bf16 %v314_v62, %v313_v61  ;;  %v523_v3 = vmul.f32 1.442695, %v517_v63 }
 0x470   :  { %v518_v2 = vsub.f32 %v501_v44, %v514_v0  ;;  %2907 = vrot.lane.b32.xlu1 %v3483_v37, %s3243_s0 }
 0x472   :  { %v525_v4 = vmul.f32 1.442695, %v518_v2 }
 0x474   :  { %2988 = vpow2.f32 %v525_v4  ;;  %2917 = vrot.lane.b32.xlu1 %v3445_v17, %s3244_s1 }
 0x475   :  { %v2985_v5 = vpop.eup %2984  ;;  %2990 = vpow2.f32 %v523_v3 }
 0x476   :  { %v530_v6 = vsel %vm502_vm3, %v2985_v5, 0.0  ;;  %v2987_v7 = vpop.eup %2986 }
 0x477   :  { %531 = vadd.xlane.f32.xlu0 %v530_v6  ;;  %v527_v8 = vsel %vm502_vm3, %v2987_v7, 0.0 }
 0x478   :  { %725 = vrot.lane.b32.xlu1 %v3441_v14, %s3245_s21 }
 0x47b   :  { %528 = vadd.xlane.f32.xlu0 %v527_v8 }
 0x47c   :  { %2922 = vrot.lane.b32.xlu1 %v3454_v23, %s3244_s1 }
 0x47e   :  { %v2989_v9 = vpop.eup %2988 }
 0x47f   :  { %v536_v10 = vsel %vm502_vm3, %v2989_v9, 0.0  ;;  %v2991_v12 = vpop.eup %2990 }
 0x480   :  { %537 = vadd.xlane.f32.xlu0 %v536_v10  ;;  %727 = vrot.lane.b32.xlu1 %v3438_v11, %s3245_s21  ;;  %v533_v13 = vsel %vm502_vm3, %v2991_v12, 0.0 }
 0x484   :  { %534 = vadd.xlane.f32.xlu0 %v533_v13  ;;  %816 = vrot.lane.b32.xlu1 %v3449_v21, %s3245_s21 }
 0x488   :  { %818 = vrot.lane.b32.xlu1 %v3447_v18, %s3245_s21 }
 0x49a   :  { %2912 = vrot.lane.b32.xlu0 %v3485_v1, %s3243_s0 }
 0x4e2   :  { %v2908_v15 = vpop.permute.xlu1 %2907 }
 0x4e3   :  { %v2910_v16 = vunpack.i.h.bf16 %v2908_v15  ;;  %v2909_v19 = vunpack.i.l.bf16 %v2908_v15 }
 0x4e5   :  { %v2781_v20 = vpack.c.bf16 %v2910_v16, %v2909_v19 }
 0x4e6   :  { %v2918_v22 = vpop.permute.xlu1 %2917 }
 0x4e7   :  { %v2920_v24 = vunpack.i.h.bf16 %v2918_v22  ;;  %v2919_v25 = vunpack.i.l.bf16 %v2918_v22  ;;  %2782 = vmatprep.subr.bf16.mxu1 %v2781_v20 }
 0x4e8   :  { %2784 = vmatpush3.bf16.msra.mxu1 %v2781_v20 }
 0x4e9   :  { %v2789_v26 = vpack.c.bf16 %v2920_v24, %v2919_v25 }
 0x4ea   :  { %v726_v28 = vpop.permute.xlu1 %725 }
 0x4eb   :  { %2791 = vmatprep.subr.msk.bf16.mxu0 %vm3459_vm2, %v2789_v26  ;;  %2639 = vmatprep.mubr.msk.f32.mxu0 %vm321_vm1, %v726_v28 }
 0x4ec   :  { %2794 = vmatpush3.bf16.xpose.msk.msra.mxu0 %vm3459_vm2, %v2789_v26 }
 0x4ee   :  { %v2923_v29 = vpop.permute.xlu1 %2922 }
 0x4ef   :  { %v2925_v42 = vunpack.i.h.bf16 %v2923_v29  ;;  %v2924_v43 = vunpack.i.l.bf16 %v2923_v29 }
 0x4f1   :  { %v2795_v47 = vpack.c.bf16 %v2925_v42, %v2924_v43 }
 0x4f2   :  { %v728_v30 = vpop.permute.xlu1 %727 }
 0x4f3   :  { %2640 = vmatmul.mubr.msk.f32.vlgmr.msra.gmra.mrb[6].mxu0 %vm321_vm1, %v728_v30 }
 0x4f6   :  { %v817_v54 = vpop.permute.xlu1 %816 }
 0x4fa   :  { %v819_v55 = vpop.permute.xlu1 %818 }
 0x504   :  { %v532_v31 = vpop.xlane.xlu0 %531 }
 0x505   :  { %2992 = vrcp.f32 %v532_v31 }
 0x508   :  { %v529_v32 = vpop.xlane.xlu0 %528 }
 0x509   :  { %2994 = vrcp.f32 %v529_v32 }
 0x50d   :  { %v538_v33 = vpop.xlane.xlu0 %537 }
 0x50e   :  { %2996 = vrcp.f32 %v538_v33 }
 0x50f   :  { %v2993_v36 = vpop.eup %2992 }
 0x510   :  { %v544_v40 = vmul.f32 %v2993_v36, %v2985_v5 }
 0x511   :  { %v535_v34 = vpop.xlane.xlu0 %534 }
 0x512   :  { %2998 = vrcp.f32 %v535_v34 }
 0x513   :  { %v2995_v38 = vpop.eup %2994 }
 0x514   :  { %v543_v39 = vmul.f32 %v2995_v38, %v2987_v7 }
 0x515   :  { %v2913_v41 = vpop.permute.xlu0 %2912 }
 0x516   :  { %v2915_v44 = vunpack.i.h.bf16 %v2913_v41  ;;  %v2914_v45 = vunpack.i.l.bf16 %v2913_v41  ;;  %2625 = vmatprep.mubr.msk.f32.mxu1 %vm502_vm3, %v543_v39 }
 0x517   :  { %2626 = vmatmul.mubr.msk.f32.vlgmr.msra.gmra.mrb[2].mxu1 %vm502_vm3, %v544_v40 }
 0x518   :  { %v2785_v46 = vpack.c.bf16 %v2915_v44, %v2914_v45  ;;  %v2997_v48 = vpop.eup %2996 }
 0x519   :  { %v546_v53 = vmul.f32 %v2997_v48, %v2989_v9 }
 0x51a   :  { %2786 = vmatprep.subr.bf16.mxu1 %v2785_v46 }
 0x51b   :  { %2788 = vmatpush3.bf16.msra.mxu1 %v2785_v46 }
 0x51c   :  { %v2999_v49 = vpop.eup %2998  ;;  %2797 = vmatprep.subr.msk.bf16.mxu1 %vm3459_vm2, %v2795_v47 }
 0x51d   :  { %v545_v51 = vmul.f32 %v2999_v49, %v2991_v12 }
 0x51f   :  { %2632 = vmatprep.mubr.msk.f32.mxu1 %vm502_vm3, %v545_v51 }
 0x520   :  { %2633 = vmatmul.mubr.msk.f32.vlgmr.msra.gmra.mrb[4].mxu1 %vm502_vm3, %v546_v53 }
 0x521   :  { %2646 = vmatprep.mubr.msk.f32.mxu1 %vm321_vm1, %v817_v54 }
 0x524   :  { %2800 = vmatpush3.bf16.xpose.msk.msra.mxu1 %vm3459_vm2, %v2795_v47 }
 0x52b   :  { %2647 = vmatmul.mubr.msk.f32.vlgmr.msra.gmra.mrb[6].mxu1 %vm321_vm1, %v819_v55 }
 0x5c6   :  { %v2641_v56 = vpop.f32.mrb[6].mxu0 }
 0x5c7   :  { %v908_v57 = vmul.f32 0.35355338, %v2641_v56  ;;  %v807_v58 = vpop.f32.mrb[7].mxu0 }
 0x5c8   :  { %v907_v59 = vmul.f32 0.35355338, %v807_v58 }
 0x5c9   :  { %v914_v60 = vsel %vm502_vm3, %v908_v57, -inf }
 0x5ca   :  { %915 = vmax.xlane.f32.xlu1 %v914_v60  ;;  %v911_v61 = vsel %vm502_vm3, %v907_v59, -inf }
 0x5cb   :  { %912 = vmax.xlane.f32.xlu0 %v911_v61 }
 0x5ea   :  { %v3519_v62 = vpop.f32.mrb[2].mxu1 }
 0x5eb   :  { %v3521_v63 = vpop.f32.mrb[3].mxu1 }
 0x5f3   :  { %v3523_v0 = vpop.f32.mrb[4].mxu1 }
 0x5f4   :  { %v3525_v2 = vpop.f32.mrb[5].mxu1 }
 0x5fe   :  { %v2648_v3 = vpop.f32.mrb[6].mxu1 }
 0x5ff   :  { %v898_v4 = vpop.f32.mrb[7].mxu1  ;;  %v910_v6 = vmul.f32 0.35355338, %v2648_v3 }
 0x600   :  { %v909_v5 = vmul.f32 0.35355338, %v898_v4 }
 0x601   :  { %v920_v8 = vsel %vm502_vm3, %v910_v6, -inf }
 0x602   :  { %v917_v7 = vsel %vm502_vm3, %v909_v5, -inf }
 0x603   :  { %918 = vmax.xlane.f32.xlu0 %v917_v7 }
 0x607   :  { %921 = vmax.xlane.f32.xlu0 %v920_v8 }
 0x657   :  { %v916_v9 = vpop.xlane.xlu1 %915 }
 0x658   :  { %v924_v10 = vsub.f32 %v908_v57, %v916_v9  ;;  %v913_v12 = vpop.xlane.xlu0 %912 }
 0x659   :  { %v923_v13 = vsub.f32 %v907_v59, %v913_v12 }
 0x65a   :  { %v929_v15 = vmul.f32 1.442695, %v924_v10 }
 0x65b   :  { %v927_v16 = vmul.f32 1.442695, %v923_v13 }
 0x65c   :  { %3000 = vpow2.f32 %v929_v15 }
 0x65d   :  { %3002 = vpow2.f32 %v927_v16 }
 0x666   :  { %v3001_v19 = vpop.eup %3000 }
 0x667   :  { %v3003_v20 = vpop.eup %3002  ;;  %v938_v22 = vsel %vm502_vm3, %v3001_v19, 0.0 }
 0x668   :  { %939 = vadd.xlane.f32.xlu1 %v938_v22  ;;  %v935_v24 = vsel %vm502_vm3, %v3003_v20, 0.0 }
 0x669   :  { %936 = vadd.xlane.f32.xlu0 %v935_v24 }
 0x679   :  { %2932 = vrot.lane.b32.xlu1 %v3485_v1, %s3246_s22 }
 0x67d   :  { %2937 = vrot.lane.b32.xlu1 %v3445_v17, %s3247_s23 }
 0x67f   :  { %2927 = vrot.lane.b32.xlu0 %v3483_v37, %s3246_s22 }
 0x681   :  { %2942 = vrot.lane.b32.xlu1 %v3454_v23, %s3247_s23 }
 0x690   :  { %v919_v25 = vpop.xlane.xlu0 %918 }
 0x691   :  { %v925_v26 = vsub.f32 %v909_v5, %v919_v25 }
 0x693   :  { %v931_v28 = vmul.f32 1.442695, %v925_v26 }
 0x694   :  { %v922_v29 = vpop.xlane.xlu0 %921 }
 0x695   :  { %3004 = vpow2.f32 %v931_v28  ;;  %v926_v30 = vsub.f32 %v910_v6, %v922_v29 }
 0x697   :  { %v933_v31 = vmul.f32 1.442695, %v926_v30 }
 0x699   :  { %3006 = vpow2.f32 %v933_v31 }
 0x69f   :  { %v3005_v32 = vpop.eup %3004 }
 0x6a0   :  { %v941_v33 = vsel %vm502_vm3, %v3005_v32, 0.0 }
 0x6a1   :  { %942 = vadd.xlane.f32.xlu0 %v941_v33 }
 0x6a3   :  { %v3007_v34 = vpop.eup %3006 }
 0x6a4   :  { %v944_v36 = vsel %vm502_vm3, %v3007_v34, 0.0 }
 0x6a5   :  { %945 = vadd.xlane.f32.xlu1 %v944_v36 }
 0x6b6   :  { %1131 = vrot.lane.b32.xlu1 %v3438_v11, %s3248_s25 }
 0x6b7   :  { %1129 = vrot.lane.b32.xlu0 %v3441_v14, %s3248_s25 }
 0x6ba   :  { %1222 = vrot.lane.b32.xlu1 %v3447_v18, %s3248_s25 }
 0x6bb   :  { %1220 = vrot.lane.b32.xlu0 %v3449_v21, %s3248_s25 }
 0x6f5   :  { %v940_v38 = vpop.xlane.xlu1 %939 }
 0x6f6   :  { %3008 = vrcp.f32 %v940_v38  ;;  %v937_v39 = vpop.xlane.xlu0 %936 }
 0x6f7   :  { %3010 = vrcp.f32 %v937_v39 }
 0x6f9   :  { %v2933_v40 = vpop.permute.xlu1 %2932 }
 0x6fa   :  { %v2928_v41 = vpop.permute.xlu0 %2927  ;;  %v2935_v42 = vunpack.i.h.bf16 %v2933_v40  ;;  %v2934_v43 = vunpack.i.l.bf16 %v2933_v40 }
 0x6fb   :  { %v2930_v44 = vunpack.i.h.bf16 %v2928_v41  ;;  %v2929_v45 = vunpack.i.l.bf16 %v2928_v41 }
 0x6fc   :  { %v2805_v51 = vpack.c.bf16 %v2935_v42, %v2934_v43 }
 0x6fd   :  { %v2801_v46 = vpack.c.bf16 %v2930_v44, %v2929_v45  ;;  %v2938_v47 = vpop.permute.xlu1 %2937 }
 0x6fe   :  { %v2940_v48 = vunpack.i.h.bf16 %v2938_v47  ;;  %v2939_v49 = vunpack.i.l.bf16 %v2938_v47 }
 0x6ff   :  { %2802 = vmatprep.subr.bf16.mxu1 %v2801_v46 }
 0x700   :  { %v3009_v53 = vpop.eup %3008  ;;  %v2809_v54 = vpack.c.bf16 %v2940_v48, %v2939_v49  ;;  %2804 = vmatpush3.bf16.msra.mxu1 %v2801_v46 }
 0x701   :  { %v3011_v55 = vpop.eup %3010  ;;  %v2943_v56 = vpop.permute.xlu1 %2942  ;;  %2806 = vmatprep.subr.bf16.mxu1 %v2805_v51  ;;  %v952_v60 = vmul.f32 %v3009_v53, %v3001_v19 }
 0x702   :  { %v2945_v57 = vunpack.i.h.bf16 %v2943_v56  ;;  %v2944_v58 = vunpack.i.l.bf16 %v2943_v56  ;;  %2811 = vmatprep.subr.msk.bf16.mxu0 %vm3459_vm2, %v2809_v54  ;;  %v951_v59 = vmul.f32 %v3011_v55, %v3003_v20 }
 0x703   :  { %2814 = vmatpush3.bf16.xpose.msk.msra.mxu0 %vm3459_vm2, %v2809_v54 }
 0x704   :  { %v2815_v61 = vpack.c.bf16 %v2945_v57, %v2944_v58  ;;  %2653 = vmatprep.mubr.msk.f32.mxu1 %vm502_vm3, %v951_v59 }
 0x705   :  { %2654 = vmatmul.mubr.msk.f32.vlgmr.msra.gmra.mrb[8].mxu1 %vm502_vm3, %v952_v60 }
 0x706   :  { %2808 = vmatpush3.bf16.msra.mxu1 %v2805_v51 }
 0x707   :  { %2817 = vmatprep.subr.msk.bf16.mxu1 %vm3459_vm2, %v2815_v61 }
 0x72e   :  { %v943_v3 = vpop.xlane.xlu0 %942 }
 0x72f   :  { %3012 = vrcp.f32 %v943_v3 }
 0x732   :  { %v946_v4 = vpop.xlane.xlu1 %945  ;;  %v1130_v5 = vpop.permute.xlu0 %1129 }
 0x733   :  { %3014 = vrcp.f32 %v946_v4  ;;  %2667 = vmatprep.mubr.msk.f32.mxu0 %vm321_vm1, %v1130_v5 }
 0x736   :  { %v1132_v6 = vpop.permute.xlu1 %1131  ;;  %v1221_v12 = vpop.permute.xlu0 %1220 }
 0x737   :  { %2668 = vmatmul.mubr.msk.f32.vlgmr.msra.gmra.mrb[8].mxu0 %vm321_vm1, %v1132_v6 }
 0x739   :  { %v3013_v7 = vpop.eup %3012 }
 0x73a   :  { %v953_v8 = vmul.f32 %v3013_v7, %v3005_v32  ;;  %v1223_v13 = vpop.permute.xlu1 %1222 }
 0x73c   :  { %2660 = vmatprep.mubr.msk.f32.mxu1 %vm502_vm3, %v953_v8 }
 0x73d   :  { %v3015_v9 = vpop.eup %3014 }
 0x73e   :  { %v954_v10 = vmul.f32 %v3015_v9, %v3007_v34 }
 0x740   :  { %2661 = vmatmul.mubr.msk.f32.vlgmr.msra.gmra.mrb[10].mxu1 %vm502_vm3, %v954_v10 }
 0x741   :  { %2820 = vmatpush3.bf16.xpose.msk.msra.mxu1 %vm3459_vm2, %v2815_v61  ;;  %2674 = vmatprep.mubr.msk.f32.mxu1 %vm321_vm1, %v1221_v12 }
 0x748   :  { %2675 = vmatmul.mubr.msk.f32.vlgmr.msra.gmra.mrb[12].mxu1 %vm321_vm1, %v1223_v13 }
 0x7d8   :  { %v3557_v15 = vpop.f32.mrb[8].mxu1 }
 0x7d9   :  { %v3559_v16 = vpop.f32.mrb[9].mxu1 }
 0x80a   :  { %v2669_v19 = vpop.f32.mrb[8].mxu0 }
 0x80b   :  { %v1312_v20 = vmul.f32 0.35355338, %v2669_v19  ;;  %v1211_v22 = vpop.f32.mrb[9].mxu0 }
 0x80c   :  { %v1311_v24 = vmul.f32 0.35355338, %v1211_v22 }
 0x80d   :  { %v1318_v25 = vsel %vm502_vm3, %v1312_v20, -inf }
 0x80e   :  { %1319 = vmax.xlane.f32.xlu1 %v1318_v25  ;;  %v1315_v26 = vsel %vm502_vm3, %v1311_v24, -inf }
 0x80f   :  { %1316 = vmax.xlane.f32.xlu0 %v1315_v26 }
 0x813   :  { %v3563_v28 = vpop.f32.mrb[10].mxu1 }
 0x814   :  { %v3565_v29 = vpop.f32.mrb[11].mxu1 }
 0x81b   :  { %v2676_v30 = vpop.f32.mrb[12].mxu1 }
 0x81c   :  { %v1302_v31 = vpop.f32.mrb[13].mxu1  ;;  %v1314_v33 = vmul.f32 0.35355338, %v2676_v30 }
 0x81d   :  { %v1313_v32 = vmul.f32 0.35355338, %v1302_v31 }
 0x81e   :  { %v1324_v36 = vsel %vm502_vm3, %v1314_v33, -inf }
 0x81f   :  { %v1321_v34 = vsel %vm502_vm3, %v1313_v32, -inf }
 0x820   :  { %1322 = vmax.xlane.f32.xlu0 %v1321_v34 }
 0x824   :  { %1325 = vmax.xlane.f32.xlu0 %v1324_v36 }
 0x89b   :  { %v1320_v38 = vpop.xlane.xlu1 %1319 }
 0x89c   :  { %v1328_v39 = vsub.f32 %v1312_v20, %v1320_v38  ;;  %v1317_v40 = vpop.xlane.xlu0 %1316 }
 0x89d   :  { %v1327_v41 = vsub.f32 %v1311_v24, %v1317_v40 }
 0x89e   :  { %v1333_v42 = vmul.f32 1.442695, %v1328_v39 }
 0x89f   :  { %v1331_v43 = vmul.f32 1.442695, %v1327_v41 }
 0x8a0   :  { %3016 = vpow2.f32 %v1333_v42 }
 0x8a1   :  { %3018 = vpow2.f32 %v1331_v43 }
 0x8aa   :  { %v3017_v44 = vpop.eup %3016 }
 0x8ab   :  { %v3019_v45 = vpop.eup %3018  ;;  %v1342_v46 = vsel %vm502_vm3, %v3017_v44, 0.0 }
 0x8ac   :  { %1343 = vadd.xlane.f32.xlu1 %v1342_v46  ;;  %v1339_v47 = vsel %vm502_vm3, %v3019_v45, 0.0 }
 0x8ad   :  { %1340 = vadd.xlane.f32.xlu0 %v1339_v47  ;;  %v1323_v48 = vpop.xlane.xlu0 %1322 }
 0x8ae   :  { %v1329_v49 = vsub.f32 %v1313_v32, %v1323_v48 }
 0x8b0   :  { %v1335_v51 = vmul.f32 1.442695, %v1329_v49 }
 0x8b1   :  { %v1326_v53 = vpop.xlane.xlu0 %1325 }
 0x8b2   :  { %v1330_v54 = vsub.f32 %v1314_v33, %v1326_v53  ;;  %3020 = vpow2.f32 %v1335_v51 }
 0x8b4   :  { %v1337_v55 = vmul.f32 1.442695, %v1330_v54 }
 0x8b6   :  { %3022 = vpow2.f32 %v1337_v55 }
 0x8bc   :  { %v3021_v56 = vpop.eup %3020 }
 0x8bd   :  { %2952 = vrot.lane.b32.xlu1 %v3485_v1, %s3249_s27  ;;  %v1345_v57 = vsel %vm502_vm3, %v3021_v56, 0.0 }
 0x8c0   :  { %v3023_v58 = vpop.eup %3022 }
 0x8c1   :  { %2957 = vrot.lane.b32.xlu1 %v3445_v17, %s3250_s28  ;;  %v1348_v59 = vsel %vm502_vm3, %v3023_v58, 0.0 }
 0x8c3   :  { %2947 = vrot.lane.b32.xlu0 %v3483_v37, %s3249_s27 }
 0x8c5   :  { %2962 = vrot.lane.b32.xlu1 %v3454_v23, %s3250_s28 }
 0x8e2   :  { %1346 = vadd.xlane.f32.xlu0 %v1345_v57 }
 0x8e9   :  { %1349 = vadd.xlane.f32.xlu1 %v1348_v59 }
 0x8f8   :  { %1533 = vrot.lane.b32.xlu0 %v3441_v14, %s3251_s29 }
 0x8fa   :  { %1535 = vrot.lane.b32.xlu1 %v3438_v11, %s3251_s29 }
 0x8fc   :  { %1624 = vrot.lane.b32.xlu0 %v3449_v21, %s3251_s29 }
 0x8fe   :  { %1626 = vrot.lane.b32.xlu1 %v3447_v18, %s3251_s29 }
 0x939   :  { %v1344_v17 = vpop.xlane.xlu1 %1343 }
 0x93a   :  { %3024 = vrcp.f32 %v1344_v17  ;;  %v1341_v23 = vpop.xlane.xlu0 %1340 }
 0x93b   :  { %3026 = vrcp.f32 %v1341_v23 }
 0x93d   :  { %v2953_v60 = vpop.permute.xlu1 %2952 }
 0x93e   :  { %v2955_v61 = vunpack.i.h.bf16 %v2953_v60  ;;  %v2954_v3 = vunpack.i.l.bf16 %v2953_v60  ;;  %v2948_v4 = vpop.permute.xlu0 %2947 }
 0x93f   :  { %v2950_v5 = vunpack.i.h.bf16 %v2948_v4  ;;  %v2949_v6 = vunpack.i.l.bf16 %v2948_v4 }
 0x940   :  { %v2825_v7 = vpack.c.bf16 %v2955_v61, %v2954_v3 }
 0x941   :  { %v2821_v8 = vpack.c.bf16 %v2950_v5, %v2949_v6  ;;  %v2958_v9 = vpop.permute.xlu1 %2957 }
 0x942   :  { %v2960_v14 = vunpack.i.h.bf16 %v2958_v9  ;;  %v2959_v10 = vunpack.i.l.bf16 %v2958_v9  ;;  %2826 = vmatprep.subr.bf16.mxu1 %v2825_v7 }
 0x943   :  { %2822 = vmatprep.subr.bf16.mxu0 %v2821_v8  ;;  %2828 = vmatpush3.bf16.msra.mxu1 %v2825_v7 }
 0x944   :  { %v3025_v11 = vpop.eup %3024  ;;  %v2829_v18 = vpack.c.bf16 %v2960_v14, %v2959_v10  ;;  %2824 = vmatpush3.bf16.msra.mxu0 %v2821_v8 }
 0x945   :  { %v3027_v21 = vpop.eup %3026  ;;  %v2963_v12 = vpop.permute.xlu1 %2962  ;;  %v1356_v22 = vmul.f32 %v3025_v11, %v3017_v44 }
 0x946   :  { %v2965_v13 = vunpack.i.h.bf16 %v2963_v12  ;;  %v2964_v19 = vunpack.i.l.bf16 %v2963_v12  ;;  %2831 = vmatprep.subr.msk.bf16.mxu0 %vm3459_vm2, %v2829_v18  ;;  %v1355_v20 = vmul.f32 %v3027_v21, %v3019_v45 }
 0x948   :  { %v2835_v24 = vpack.c.bf16 %v2965_v13, %v2964_v19  ;;  %2681 = vmatprep.mubr.msk.f32.mxu0 %vm502_vm3, %v1355_v20 }
 0x949   :  { %2682 = vmatmul.mubr.msk.f32.vlgmr.msra.gmra.mrb[10].mxu0 %vm502_vm3, %v1356_v22 }
 0x94a   :  { %2837 = vmatprep.subr.msk.bf16.mxu1 %vm3459_vm2, %v2835_v24 }
 0x94d   :  { %2834 = vmatpush3.bf16.xpose.msk.msra.mxu0 %vm3459_vm2, %v2829_v18 }
 0x96f   :  { %v1347_v25 = vpop.xlane.xlu0 %1346 }
 0x970   :  { %3028 = vrcp.f32 %v1347_v25 }
 0x973   :  { %v1534_v26 = vpop.permute.xlu0 %1533 }
 0x974   :  { %2695 = vmatprep.mubr.msk.f32.mxu0 %vm321_vm1, %v1534_v26 }
 0x976   :  { %v1350_v30 = vpop.xlane.xlu1 %1349 }
 0x977   :  { %3030 = vrcp.f32 %v1350_v30  ;;  %v1625_v38 = vpop.permute.xlu0 %1624 }
 0x97a   :  { %v3029_v31 = vpop.eup %3028  ;;  %v1536_v32 = vpop.permute.xlu1 %1535 }
 0x97b   :  { %2696 = vmatmul.mubr.msk.f32.vlgmr.msra.gmra.mrb[12].mxu0 %vm321_vm1, %v1536_v32  ;;  %v1357_v33 = vmul.f32 %v3029_v31, %v3021_v56 }
 0x97d   :  { %2688 = vmatprep.mubr.msk.f32.mxu1 %vm502_vm3, %v1357_v33 }
 0x97e   :  { %v1627_v39 = vpop.permute.xlu1 %1626 }
 0x981   :  { %v3031_v34 = vpop.eup %3030 }
 0x982   :  { %v1358_v36 = vmul.f32 %v3031_v34, %v3023_v58 }
 0x984   :  { %2689 = vmatmul.mubr.msk.f32.vlgmr.msra.gmra.mrb[14].mxu1 %vm502_vm3, %v1358_v36 }
 0x985   :  { %2840 = vmatpush3.bf16.xpose.msk.msra.mxu1 %vm3459_vm2, %v2835_v24  ;;  %2702 = vmatprep.mubr.msk.f32.mxu1 %vm321_vm1, %v1625_v38 }
 0x98c   :  { %2703 = vmatmul.mubr.msk.f32.vlgmr.msra.gmra.mrb[16].mxu1 %vm321_vm1, %v1627_v39 }
 0xa1c   :  { %v2683_v40 = vpop.f32.mrb[10].mxu0 }
 0xa1d   :  { %v1437_v41 = vpop.f32.mrb[11].mxu0 }
 0xa4e   :  { %v2697_v42 = vpop.f32.mrb[12].mxu0 }
 0xa4f   :  { %v1716_v43 = vmul.f32 0.35355338, %v2697_v42  ;;  %v1615_v44 = vpop.f32.mrb[13].mxu0  ;;  %v1999_v42 = vld [vmem:[#allocation8 + $0x8] sm:$0xff] }
 0xa50   :  { %v1715_v45 = vmul.f32 0.35355338, %v1615_v44 }
 0xa51   :  { %v1722_v46 = vsel %vm502_vm3, %v1716_v43, -inf }
 0xa52   :  { %1723 = vmax.xlane.f32.xlu1 %v1722_v46  ;;  %v1719_v47 = vsel %vm502_vm3, %v1715_v45, -inf }
 0xa53   :  { %1720 = vmax.xlane.f32.xlu0 %v1719_v47 }
 0xa57   :  { %v3599_v48 = vpop.f32.mrb[14].mxu1 }
 0xa58   :  { %v3601_v27 = vpop.f32.mrb[15].mxu1 }
 0xa5f   :  { %v2704_v49 = vpop.f32.mrb[16].mxu1 }
 0xa60   :  { %v1706_v51 = vpop.f32.mrb[17].mxu1  ;;  %v1718_v54 = vmul.f32 0.35355338, %v2704_v49 }
 0xa61   :  { %v1717_v53 = vmul.f32 0.35355338, %v1706_v51 }
 0xa62   :  { %v1728_v56 = vsel %vm502_vm3, %v1718_v54, -inf }
 0xa63   :  { %v1725_v55 = vsel %vm502_vm3, %v1717_v53, -inf }
 0xa64   :  { %1726 = vmax.xlane.f32.xlu0 %v1725_v55 }
 0xa68   :  { %1729 = vmax.xlane.f32.xlu0 %v1728_v56 }
 0xadf   :  { %v1724_v57 = vpop.xlane.xlu1 %1723 }
 0xae0   :  { %v1732_v58 = vsub.f32 %v1716_v43, %v1724_v57  ;;  %v1721_v59 = vpop.xlane.xlu0 %1720  ;;  %v2000_v43 = vld [vmem:[#allocation8 + $0x10] sm:$0xff] }
 0xae1   :  { %v1731_v17 = vsub.f32 %v1715_v45, %v1721_v59  ;;  %v2001_v45 = vld [vmem:[#allocation8 + $0x18] sm:$0xff] }
 0xae2   :  { %v1737_v23 = vmul.f32 1.442695, %v1732_v58  ;;  %v2853_v46 = vpack.c.bf16 %v2001_v45, %v2000_v43 }
 0xae3   :  { %v1735_v60 = vmul.f32 1.442695, %v1731_v17 }
 0xae4   :  { %3032 = vpow2.f32 %v1737_v23 }
 0xae5   :  { %3034 = vpow2.f32 %v1735_v60 }
 0xaee   :  { %v3033_v61 = vpop.eup %3032 }
 0xaef   :  { %v3035_v3 = vpop.eup %3034  ;;  %v1746_v4 = vsel %vm502_vm3, %v3033_v61, 0.0 }
 0xaf0   :  { %1747 = vadd.xlane.f32.xlu1 %v1746_v4  ;;  %v1743_v5 = vsel %vm502_vm3, %v3035_v3, 0.0 }
 0xaf1   :  { %v1727_v6 = vpop.xlane.xlu0 %1726  ;;  %1744 = vadd.xlane.f32.xlu0 %v1743_v5 }
 0xaf2   :  { %v1733_v7 = vsub.f32 %v1717_v53, %v1727_v6 }
 0xaf4   :  { %v1739_v8 = vmul.f32 1.442695, %v1733_v7 }
 0xaf5   :  { %v1730_v9 = vpop.xlane.xlu0 %1729 }
 0xaf6   :  { %3036 = vpow2.f32 %v1739_v8  ;;  %v1734_v14 = vsub.f32 %v1718_v54, %v1730_v9 }
 0xaf8   :  { %v1741_v10 = vmul.f32 1.442695, %v1734_v14 }
 0xafa   :  { %3038 = vpow2.f32 %v1741_v10  ;;  %v2004_v10 = vsub.s32 5, %v3414_v35 }
 0xb00   :  { %v3037_v11 = vpop.eup %3036 }
 0xb01   :  { %v1749_v18 = vsel %vm502_vm3, %v3037_v11, 0.0 }
 0xb02   :  { %1750 = vadd.xlane.f32.xlu0 %v1749_v18 }
 0xb04   :  { %v3039_v21 = vpop.eup %3038 }
 0xb05   :  { %v1752_v12 = vsel %vm502_vm3, %v3039_v21, 0.0 }
 0xb06   :  { %1753 = vadd.xlane.f32.xlu1 %v1752_v12 }
 0xb17   :  { %2972 = vrot.lane.b32.xlu1 %v3485_v1, %s3252_s30 }
 0xb18   :  { %2967 = vrot.lane.b32.xlu0 %v3483_v37, %s3252_s30 }
 0xb1b   :  { %1941 = vrot.lane.b32.xlu1 %v3559_v16, %s3236_s10 }
 0xb1c   :  { %1957 = vrot.lane.b32.xlu0 %v1437_v41, %s3253_s7  ;;  %v1998_v41 = vld [vmem:[#allocation8] sm:$0xff] }
 0xb1d   :  { %v2849_v44 = vpack.c.bf16 %v1999_v42, %v1998_v41 }
 0xb1f   :  { %1943 = vrot.lane.b32.xlu1 %v3557_v15, %s3236_s10 }
 0xb23   :  { %1959 = vrot.lane.b32.xlu1 %v2683_v40, %s3253_s7 }
 0xb7d   :  { %v1748_v20 = vpop.xlane.xlu1 %1747 }
 0xb7e   :  { %v1745_v13 = vpop.xlane.xlu0 %1744 }
 0xb7f   :  { %3040 = vrcp.f32 %v1745_v13  ;;  %v3065_v13 = vld [vmem:[#allocation2 + $0x8] sm:$0xff] }
 0xb80   :  { %3042 = vrcp.f32 %v1748_v20  ;;  %v3066_v20 = vld [vmem:[#allocation2] sm:$0xff] }
 0xb89   :  { %v3041_v19 = vpop.eup %3040 }
 0xb8a   :  { %v1759_v22 = vmul.f32 %v3041_v19, %v3035_v3  ;;  %v3043_v30 = vpop.eup %3042 }
 0xb8b   :  { %v1760_v34 = vmul.f32 %v3043_v30, %v3033_v61  ;;  %v3067_v30 = vld [vmem:[#allocation2 + $0x10] sm:$0xff] }
 0xb8c   :  { %2709 = vmatprep.mubr.msk.f32.mxu0 %vm502_vm3, %v1759_v22 }
 0xb8f   :  { %v1751_v37 = vpop.xlane.xlu0 %1750 }
 0xb90   :  { %3044 = vrcp.f32 %v1751_v37 }
 0xb93   :  { %v1754_v1 = vpop.xlane.xlu1 %1753  ;;  %v2968_v16 = vpop.permute.xlu0 %2967 }
 0xb94   :  { %3046 = vrcp.f32 %v1754_v1  ;;  %v2970_v24 = vunpack.i.h.bf16 %v2968_v16  ;;  %v2969_v25 = vunpack.i.l.bf16 %v2968_v16 }
 0xb96   :  { %v2841_v26 = vpack.c.bf16 %v2970_v24, %v2969_v25 }
 0xb97   :  { %v2973_v15 = vpop.permute.xlu1 %2972  ;;  %v1958_v57 = vpop.permute.xlu0 %1957 }
 0xb98   :  { %v2975_v31 = vunpack.i.h.bf16 %v2973_v15  ;;  %v2974_v32 = vunpack.i.l.bf16 %v2973_v15  ;;  %2842 = vmatprep.subr.bf16.mxu0 %v2841_v26 }
 0xb99   :  { %2844 = vmatpush3.bf16.msra.mxu0 %v2841_v26 }
 0xb9a   :  { %v3045_v33 = vpop.eup %3044  ;;  %v2845_v36 = vpack.c.bf16 %v2975_v31, %v2974_v32  ;;  %2850 = vmatprep.subr.bf16.mxu0 %v2849_v44  ;;  %v3068_v31 = vld [vmem:[#allocation2 + $0x18] sm:$0xff] }
 0xb9b   :  { %v1761_v38 = vmul.f32 %v3045_v33, %v3037_v11  ;;  %v1942_v54 = vpop.permute.xlu1 %1941 }
 0xb9c   :  { %2710 = vmatmul.mubr.msk.f32.vlgmr.msra.gmra.mrb[14].mxu0 %vm502_vm3, %v1760_v34  ;;  %2846 = vmatprep.subr.bf16.mxu1 %v2845_v36  ;;  %v1985_v58 = vsel %vm321_vm1, %v3521_v63, %v1942_v54 }
 0xb9d   :  { %2848 = vmatpush3.bf16.msra.mxu1 %v2845_v36  ;;  %2716 = vmatprep.mubr.msk.f32.mxu1 %vm502_vm3, %v1761_v38  ;;  %v1989_v59 = vsel %vm502_vm3, %v1985_v58, %v1958_v57 }
 0xb9e   :  { %v3047_v39 = vpop.eup %3046  ;;  %2852 = vmatpush3.bf16.msra.mxu0 %v2849_v44 }
 0xb9f   :  { %v1762_v40 = vmul.f32 %v3047_v39, %v3039_v21  ;;  %2854 = vmatprep.subr.bf16.mxu0 %v2853_v46  ;;  %v1944_v55 = vpop.permute.xlu1 %1943 }
 0xba1   :  { %2717 = vmatmul.mubr.msk.f32.vlgmr.msra.gmra.mrb[18].mxu1 %vm502_vm3, %v1762_v40 }
 0xba2   :  { %2856 = vmatpush3.bf16.msra.mxu0 %v2853_v46 }
 0xba3   :  { %v1960_v56 = vpop.permute.xlu1 %1959 }
 0xc6f   :  { %v2711_v47 = vpop.f32.mrb[14].mxu0 }
 0xc70   :  { %1975 = vrot.lane.b32.xlu1 %v2711_v47, %s3254_s8  ;;  %v1841_v49 = vpop.f32.mrb[15].mxu0 }
 0xc71   :  { %1973 = vrot.lane.b32.xlu0 %v1841_v49, %s3254_s8 }
 0xc74   :  { %v2718_v51 = vpop.f32.mrb[18].mxu1  ;;  %1947 = vrot.lane.b32.xlu1 %v3563_v28, %s3236_s10 }
 0xc75   :  { %v1928_v53 = vpop.f32.mrb[19].mxu1  ;;  %1945 = vrot.lane.b32.xlu0 %v3565_v29, %s3236_s10  ;;  %v1986_v29 = vsel %vm321_vm1, %v3519_v62, %v1944_v55 }
 0xc76   :  { %v1990_v17 = vsel %vm502_vm3, %v1986_v29, %v1960_v56  ;;  %v2175_v29 = vld [vmem:[#allocation10] sm:$0xff] }
 0xc78   :  { %1963 = vrot.lane.b32.xlu1 %v3599_v48, %s3253_s7 }
 0xc79   :  { %1961 = vrot.lane.b32.xlu0 %v3601_v27, %s3253_s7 }
 0xc7c   :  { %1979 = vrot.lane.b32.xlu1 %v2718_v51, %s3254_s8 }
 0xc7d   :  { %1977 = vrot.lane.b32.xlu0 %v1928_v53, %s3254_s8 }
 0xce2   :  { %v1976_v28 = vpop.permute.xlu1 %1975 }
 0xce3   :  { %v1974_v48 = vpop.permute.xlu0 %1973  ;;  %v1995_v23 = vsel %vm1993_vm4, %v1990_v17, %v1976_v28  ;;  %v2177_v17 = vld [vmem:[#allocation10 + $0x10] sm:$0xff] }
 0xce4   :  { %v1994_v27 = vsel %vm1993_vm4, %v1989_v59, %v1974_v48  ;;  %v2176_v59 = vld [vmem:[#allocation10 + $0x8] sm:$0xff] }
 0xce5   :  { %2727 = vmatprep.mubr.msk.f32.mxu0 %vm112_vm0, %v1994_v27  ;;  %v2857_v48 = vpack.c.bf16 %v2176_v59, %v2175_v29  ;;  %v2178_v27 = vld [vmem:[#allocation10 + $0x18] sm:$0xff] }
 0xce6   :  { %v1948_v60 = vpop.permute.xlu1 %1947  ;;  %2728 = vmatmul.mubr.msk.f32.vlgmr.msra.gmra.mrb[16].mxu0 %vm112_vm0, %v1995_v23  ;;  %v2861_v23 = vpack.c.bf16 %v2178_v27, %v2177_v17 }
 0xce7   :  { %v1946_v63 = vpop.permute.xlu0 %1945  ;;  %v1988_v5 = vsel %vm321_vm1, %v3523_v0, %v1948_v60  ;;  %2858 = vmatprep.subr.bf16.mxu1 %v2857_v48 }
 0xce8   :  { %v1987_v62 = vsel %vm321_vm1, %v3525_v2, %v1946_v63  ;;  %v3650_v2 = vld [vmem:[#allocation5] sm:$0xff]  ;;  %2860 = vmatpush3.bf16.msra.mxu1 %v2857_v48 }
 0xce9   :  { %v2005_v11 = vrot.slane %v3650_v2, %v2004_v10  ;;  %2862 = vmatprep.subr.bf16.mxu1 %v2861_v23 }
 0xcea   :  { %v1964_v61 = vpop.permute.xlu1 %1963 }
 0xceb   :  { %v1962_v3 = vpop.permute.xlu0 %1961  ;;  %v1992_v8 = vsel %vm502_vm3, %v1988_v5, %v1964_v61  ;;  %v2161_v5 = vsub.s32 6, %v3414_v35 }
 0xcec   :  { %v1991_v6 = vsel %vm502_vm3, %v1987_v62, %v1962_v3  ;;  %2864 = vmatpush3.bf16.msra.mxu1 %v2861_v23 }
 0xcee   :  { %v1980_v4 = vpop.permute.xlu1 %1979 }
 0xcef   :  { %v1978_v7 = vpop.permute.xlu0 %1977  ;;  %v1997_v14 = vsel %vm1993_vm4, %v1992_v8, %v1980_v4 }
 0xcf0   :  { %v1996_v9 = vsel %vm1993_vm4, %v1991_v6, %v1978_v7  ;;  %v2169_v7 = vsub.s32 7, %v3414_v35 }
 0xcf1   :  { %2730 = vmatprep.mubr.msk.f32.mxu0 %vm112_vm0, %v1996_v9  ;;  %v2162_v9 = vrot.slane %v3650_v2, %v2161_v5 }
 0xcf2   :  { %2731 = vmatmul.mubr.msk.f32.gmra.mrb[18].mxu0 %vm112_vm0, %v1997_v14 }
 0xdb9   :  { %v2729_v0 = vpop.f32.mrb[16].mxu0 }
 0xdba   :  { %v2090_v18 = vadd.f32 %v2729_v0, %v2005_v11  ;;  %v2084_v21 = vpop.f32.mrb[17].mxu0 }
 0xdbb   :  { %v2085_v12 = vadd.f32 %v2084_v21, %v2005_v11 }
 0xdbc   :  { %v3653_v19 = vadd.f32 %v3065_v13, %v2090_v18 }
 0xdbd   :  { %v3655_v22 = vadd.f32 %v3066_v20, %v2085_v12  ;;  %v2170_v12 = vrot.slane %v3650_v2, %v2169_v7 }
 0xdbe   :  { %v2110_v37 = vsel %vm112_vm0, %v3653_v19, 0.0 }
 0xdbf   :  { %2111 = vadd.xlane.f32.xlu1 %v2110_v37  ;;  %v2107_v1 = vsel %vm112_vm0, %v3655_v22, 0.0 }
 0xdc0   :  { %2108 = vadd.xlane.f32.xlu0 %v2107_v1 }
 0xdc5   :  { %v2732_v16 = vpop.f32.mrb[18].mxu0 }
 0xdc6   :  { %v2094_v24 = vpop.f32.mrb[19].mxu0  ;;  %v2100_v25 = vadd.f32 %v2732_v16, %v2005_v11 }
 0xdc7   :  { %v2095_v26 = vadd.f32 %v2094_v24, %v2005_v11 }
 0xdc8   :  { %v3663_v32 = vadd.f32 %v3068_v31, %v2100_v25 }
 0xdc9   :  { %v3661_v15 = vadd.f32 %v3067_v30, %v2095_v26 }
 0xdca   :  { %v2116_v34 = vsel %vm112_vm0, %v3663_v32, 0.0 }
 0xdcb   :  { %v2113_v33 = vsel %vm112_vm0, %v3661_v15, 0.0 }
 0xdcc   :  { %2114 = vadd.xlane.f32.xlu0 %v2113_v33 }
 0xdd0   :  { %2117 = vadd.xlane.f32.xlu0 %v2116_v34 }
 0xe4c   :  { %v2112_v36 = vpop.xlane.xlu1 %2111 }
 0xe4d   :  { %v2120_v38 = vmul.f32 0.03125, %v2112_v36  ;;  %v2109_v39 = vpop.xlane.xlu0 %2108 }
 0xe4e   :  { %v2119_v40 = vmul.f32 0.03125, %v2109_v39  ;;  %v2301_v39 = vld [vmem:[#allocation11 + $0x8] sm:$0xff] }
 0xe4f   :  { %v2124_v41 = vsub.f32 %v3653_v19, %v2120_v38  ;;  %v2300_v38 = vld [vmem:[#allocation11] sm:$0xff] }
 0xe50   :  { %v2123_v42 = vsub.f32 %v3655_v22, %v2119_v40  ;;  %v2865_v40 = vpack.c.bf16 %v2301_v39, %v2300_v38 }
 0xe51   :  { %v2128_v43 = vmul.f32 %v2124_v41, %v2124_v41 }
 0xe52   :  { %v2127_v44 = vmul.f32 %v2123_v42, %v2123_v42  ;;  %2866 = vmatprep.subr.bf16.mxu0 %v2865_v40 }
 0xe53   :  { %v2134_v45 = vsel %vm112_vm0, %v2128_v43, 0.0  ;;  %2868 = vmatpush3.bf16.msra.mxu0 %v2865_v40 }
 0xe54   :  { %2135 = vadd.xlane.f32.xlu1 %v2134_v45  ;;  %v2131_v46 = vsel %vm112_vm0, %v2127_v44, 0.0  ;;  %v111_v44 = vld [vmem:[#allocation5 + $0x8] sm:$0x3] }
 0xe55   :  { %2132 = vadd.xlane.f32.xlu0 %v2131_v46  ;;  %v2182_v45 = vrot.slane %v111_v44, %v168_v50 }
 0xe59   :  { %v2115_v47 = vpop.xlane.xlu0 %2114 }
 0xe5a   :  { %v2121_v49 = vmul.f32 0.03125, %v2115_v47 }
 0xe5c   :  { %v2125_v51 = vsub.f32 %v3661_v15, %v2121_v49 }
 0xe5d   :  { %v2118_v53 = vpop.xlane.xlu0 %2117 }
 0xe5e   :  { %v2122_v54 = vmul.f32 0.03125, %v2118_v53  ;;  %v2129_v55 = vmul.f32 %v2125_v51, %v2125_v51 }
 0xe60   :  { %v2126_v56 = vsub.f32 %v3663_v32, %v2122_v54  ;;  %v2137_v57 = vsel %vm112_vm0, %v2129_v55, 0.0 }
 0xe61   :  { %2138 = vadd.xlane.f32.xlu0 %v2137_v57 }
 0xe62   :  { %v2130_v58 = vmul.f32 %v2126_v56, %v2126_v56 }
 0xe64   :  { %v2140_v28 = vsel %vm112_vm0, %v2130_v58, 0.0 }
 0xe65   :  { %2141 = vadd.xlane.f32.xlu1 %v2140_v28 }
 0xee1   :  { %v2136_v60 = vpop.xlane.xlu1 %2135 }
 0xee2   :  { %v2144_v63 = vmul.f32 0.03125, %v2136_v60  ;;  %v2133_v61 = vpop.xlane.xlu0 %2132 }
 0xee3   :  { %v2143_v3 = vmul.f32 0.03125, %v2133_v61 }
 0xee4   :  { %v2148_v62 = vadd.f32 1e-05, %v2144_v63 }
 0xee5   :  { %v2147_v4 = vadd.f32 1e-05, %v2143_v3 }
 0xee6   :  { %3048 = vrsqrt.f32 %v2148_v62 }
 0xee7   :  { %3050 = vrsqrt.f32 %v2147_v4 }
 0xeee   :  { %v2139_v6 = vpop.xlane.xlu0 %2138 }
 0xeef   :  { %v2145_v8 = vmul.f32 0.03125, %v2139_v6 }
 0xef0   :  { %v3049_v14 = vpop.eup %3048 }
 0xef1   :  { %v3051_v10 = vpop.eup %3050  ;;  %v2156_v11 = vmul.f32 %v3049_v14, %v2124_v41  ;;  %v2149_v0 = vadd.f32 1e-05, %v2145_v8  ;;  %v2302_v41 = vld [vmem:[#allocation11 + $0x10] sm:$0xff] }
 0xef2   :  { %v2142_v18 = vpop.xlane.xlu1 %2141  ;;  %v2155_v21 = vmul.f32 %v3051_v10, %v2123_v42  ;;  %v2303_v42 = vld [vmem:[#allocation11 + $0x18] sm:$0xff] }
 0xef3   :  { %3052 = vrsqrt.f32 %v2149_v0  ;;  %v2146_v13 = vmul.f32 0.03125, %v2142_v18  ;;  %v2164_v20 = vmul.f32 %v2162_v9, %v2156_v11  ;;  %v2869_v43 = vpack.c.bf16 %v2303_v42, %v2302_v41 }
 0xef4   :  { %v2163_v37 = vmul.f32 %v2162_v9, %v2155_v21 }
 0xef5   :  { %v2150_v1 = vadd.f32 1e-05, %v2146_v13  ;;  %v2172_v24 = vadd.f32 %v2170_v12, %v2164_v20  ;;  %2870 = vmatprep.subr.bf16.mxu0 %v2869_v43 }
 0xef6   :  { %v2171_v16 = vadd.f32 %v2170_v12, %v2163_v37  ;;  %2872 = vmatpush3.bf16.msra.mxu0 %v2869_v43 }
 0xef7   :  { %3054 = vrsqrt.f32 %v2150_v1 }
 0xef8   :  { %2741 = vmatprep.mubr.msk.f32.mxu1 %vm112_vm0, %v2171_v16 }
 0xef9   :  { %2742 = vmatmul.mubr.msk.f32.vlgmr.msra.gmra.mrb[20].mxu1 %vm112_vm0, %v2172_v24 }
 0xefd   :  { %v3053_v25 = vpop.eup %3052 }
 0xefe   :  { %v2157_v26 = vmul.f32 %v3053_v25, %v2125_v51 }
 0xf00   :  { %v2165_v30 = vmul.f32 %v2162_v9, %v2157_v26 }
 0xf01   :  { %v3055_v31 = vpop.eup %3054 }
 0xf02   :  { %v2173_v33 = vadd.f32 %v2170_v12, %v2165_v30  ;;  %v2158_v34 = vmul.f32 %v3055_v31, %v2126_v56 }
 0xf04   :  { %2744 = vmatprep.mubr.msk.f32.mxu1 %vm112_vm0, %v2173_v33  ;;  %v2166_v2 = vmul.f32 %v2162_v9, %v2158_v34  ;;  %v2307_v9 = vrot.slane %v111_v44, %v176_v52 }
 0xf06   :  { %v2174_v36 = vadd.f32 %v2170_v12, %v2166_v2 }
 0xf08   :  { %2745 = vmatmul.mubr.msk.f32.gmra.mrb[22].mxu1 %vm112_vm0, %v2174_v36 }
 0xfcc   :  { %v2743_v46 = vpop.f32.mrb[20].mxu1 }
 0xfcd   :  { %v2267_v47 = vadd.f32 %v2743_v46, %v2182_v45  ;;  %v2261_v49 = vpop.f32.mrb[21].mxu1 }
 0xfce   :  { %v2262_v51 = vadd.f32 %v2261_v49, %v2182_v45 }
 0xfcf   :  { %v2285_v53 = vmul.f32 0.70710677, %v2267_v47  ;;  %v2281_v27 = vmul.f32 0.5, %v2267_v47 }
 0xfd0   :  { %v2284_v54 = vmul.f32 0.70710677, %v2262_v51  ;;  %v2280_v59 = vmul.f32 0.5, %v2262_v51 }
 0xfd1   :  { %3056 = verf.f32 %v2285_v53 }
 0xfd2   :  { %3058 = verf.f32 %v2284_v54 }
 0xfdb   :  { %v3057_v55 = vpop.eup %3056  ;;  %v2746_v56 = vpop.f32.mrb[22].mxu1 }
 0xfdc   :  { %v3059_v57 = vpop.eup %3058  ;;  %v2293_v58 = vadd.f32 1.0, %v3057_v55  ;;  %v2277_v28 = vadd.f32 %v2746_v56, %v2182_v45  ;;  %v2271_v29 = vpop.f32.mrb[23].mxu1 }
 0xfdd   :  { %v2292_v48 = vadd.f32 1.0, %v3059_v57  ;;  %v2272_v17 = vadd.f32 %v2271_v29, %v2182_v45 }
 0xfde   :  { %v2287_v23 = vmul.f32 0.70710677, %v2277_v28  ;;  %v2297_v63 = vmul.f32 %v2293_v58, %v2281_v27  ;;  %v2283_v6 = vmul.f32 0.5, %v2277_v28 }
 0xfdf   :  { %v2296_v50 = vmul.f32 %v2292_v48, %v2280_v59  ;;  %v2286_v60 = vmul.f32 0.70710677, %v2272_v17  ;;  %v2282_v4 = vmul.f32 0.5, %v2272_v17 }
 0xfe0   :  { %3060 = verf.f32 %v2287_v23 }
 0xfe1   :  { %3062 = verf.f32 %v2286_v60  ;;  %2755 = vmatprep.mubr.msk.f32.mxu0 %vm112_vm0, %v2296_v50 }
 0xfe2   :  { %2756 = vmatmul.mubr.msk.f32.vlgmr.msra.gmra.mrb[20].mxu0 %vm112_vm0, %v2297_v63 }
 0xfea   :  { %v3061_v61 = vpop.eup %3060 }
 0xfeb   :  { %v3063_v3 = vpop.eup %3062  ;;  %v2295_v62 = vadd.f32 1.0, %v3061_v61 }
 0xfec   :  { %v2294_v5 = vadd.f32 1.0, %v3063_v3 }
 0xfed   :  { %v2299_v8 = vmul.f32 %v2295_v62, %v2283_v6 }
 0xfee   :  { %v2298_v7 = vmul.f32 %v2294_v5, %v2282_v4 }
 0xff0   :  { %2758 = vmatprep.mubr.msk.f32.mxu0 %vm112_vm0, %v2298_v7 }
 0xff1   :  { %2759 = vmatmul.mubr.msk.f32.gmra.mrb[22].mxu0 %vm112_vm0, %v2299_v8 }
0x10b5   :  { %v2757_v14 = vpop.f32.mrb[20].mxu0 }
0x10b6   :  { %v2392_v10 = vadd.f32 %v2757_v14, %v2307_v9  ;;  %v2386_v11 = vpop.f32.mrb[21].mxu0 }
0x10b7   :  { %v2387_v0 = vadd.f32 %v2386_v11, %v2307_v9 }
0x10b8   :  { %v2406_v18 = vadd.f32 %v2392_v10, %v3653_v19 }
0x10b9   :  { %v2405_v21 = vadd.f32 %v2387_v0, %v3655_v22 }
0x10ba   :  { %2410 = vst.msk [vmem:[#allocation13 + $0x8] sm:$0xff] %vm112_vm0, %v2406_v18 }
0x10bb   :  { %2409 = vst.msk [vmem:[#allocation13] sm:$0xff] %vm112_vm0, %v2405_v21 }
0x10c4   :  { %v2760_v12 = vpop.f32.mrb[22].mxu0 }
0x10c5   :  { %v2402_v13 = vadd.f32 %v2760_v12, %v2307_v9  ;;  %v2396_v20 = vpop.f32.mrb[23].mxu0 }
0x10c6   :  { %v2397_v37 = vadd.f32 %v2396_v20, %v2307_v9 }
0x10c7   :  { %v2408_v35 = vadd.f32 %v2402_v13, %v3663_v32 }
0x10c8   :  { %v2407_v52 = vadd.f32 %v2397_v37, %v3661_v15 }
0x10c9   :  { %2412 = vst.msk [vmem:[#allocation13 + $0x18] sm:$0xff] %vm112_vm0, %v2408_v35 }
0x10ca   :  { %2411 = vst.msk [vmem:[#allocation13 + $0x10] sm:$0xff] %vm112_vm0, %v2407_v52 }
0x10cb   :  { %3212 = shalt.err (!%p3209_p10)
}
0x10cc   :  { %s3213_s12 = scalar_lea.hbm %s3722_s6, 512 }
0x10cd   :  { %p3214_p11 = scmp.ne.s32.totalorder %s3722_s6, %s3213_s12  ;;  %p3217_p12 = scmp.lt.u32.totalorder %s3213_s12, %s3722_s6 }
0x10cf   :  { %p3219_p13 = pnand %p3217_p12, %p3214_p11 }
0x10d1   :  { %3222 = shalt.err (!%p3219_p13)
}
0x10d2   :  { %2424 = dma.vmem_to_hbm [thread:$0]  %s2419_s2, 512, %s3722_s6, [#allocation4], %s3235_s9, %s3235_s9, %s3236_s10  }
0x10d3   :  { %3231 = dma.done.wait [#allocation4], 512  }
0x10d4   :  { %3232 = vsyncadd [#allocation4], 4294966784 }
0x10d5   :  { %2428 = vsyncpa [#allocation3], 1 }
0x10d6   :  { %2429 = vsyncpa [#allocation6], 1 }
0x10d7   :  { %2430 = vsyncpa [#allocation9], 1 }
0x10d8   :  { %2431 = vsyncpa [#allocation12], 1 }
0x10d9   :  { %2432 = vsyncpa [#allocation4], 1 }

</bundles_post_ra>
